<compile_context>
chip_gen: v7x
topology: tpu7x:2x2x1
jax: 0.10.0
libtpu: 0.0.40
codegen_flags: <defaults>
</compile_context>

<pallas_src>
import functools

import jax
import jax.numpy as jnp
from jax.experimental import pallas as pl
from jax.experimental.pallas import tpu as pltpu


def _tree_sum(terms):
    """Pairwise (log-depth) sum of a list of same-shaped arrays."""
    terms = list(terms)
    while len(terms) > 1:
        nxt = [terms[i] + terms[i + 1] for i in range(0, len(terms) - 1, 2)]
        if len(terms) % 2:
            nxt.append(terms[-1])
        terms = nxt
    return terms[0]


def _vmem_limit_bytes(feature_bytes):
    """Chip-aware scoped-VMEM limit with generous headroom."""
    try:
        cap = pltpu.get_tpu_info().vmem_capacity_bytes
    except Exception:
        cap = 64 * 1024 * 1024  # v7x per-TC physical; safe lower bound
    want = max(4 * feature_bytes, 16 * 1024 * 1024)
    return int(min(want, (3 * cap) // 4))


def _gtg_ll_kernel(*refs, num_features, batch, interm_dim, channels, spatials):
    """Single-step kernel: all branches processed sequentially in VMEM.

    Ref ordering:
      feat_0..L-1 : (B, C_i, S_i)  f32, VMEM (whole array)
      w_0..L-1    : (C_i, D)       f32, VMEM (branch Linear weights)
      b_stack     : (L, D)         f32, VMEM (branch Linear biases)
      wc_stack    : (L, D)         f32, VMEM (classifier weight rows)
      clf_b       : (1, 1)         f32, VMEM
      out_ref     : (B, 1)         f32
    """
    L = num_features
    feat_refs = refs[0:L]
    w_refs = refs[L:2 * L]
    b_ref = refs[2 * L]
    wc_ref = refs[2 * L + 1]
    clfb_ref = refs[2 * L + 2]
    out_ref = refs[2 * L + 3]

    B, D = batch, interm_dim

    total = jnp.zeros((B, 1), jnp.float32)
    for br in range(L):
        C, S = channels[br], spatials[br]
        # Global average pool: lane reduce over the spatial axis, then the
        # constant 1/S scale (one VPU multiply).
        pooled = jnp.sum(feat_refs[br][...], axis=-1) * (1.0 / float(S))  # (B, C)

        # Branch Linear on the VPU: per-channel broadcast multiply, log-depth
        # tree sum (C <= 16 -> a handful of VALU ops, no MXU fill/drain).
        terms = [pooled[:, c:c + 1] * w_refs[br][c:c + 1, :] for c in range(C)]
        h = _tree_sum(terms) + b_ref[br:br + 1, :]                        # (B, D)
        h = jnp.maximum(h, 0.0)                                           # ReLU

        # Classifier partial for this branch (VPU multiply + lane reduce);
        # accumulating here removes the external concat/sum entirely.
        total = total + jnp.sum(h * wc_ref[br:br + 1, :], axis=-1, keepdims=True)

    out_ref[...] = (total + clfb_ref[...]).astype(out_ref.dtype)          # (B, 1)


def module_ll_forward(features_nchw, lin_weights, lin_biases, clf_w, clf_b):
    """features_nchw: list of (B, C_i, E_i, E_i) arrays (PyTorch NCHW)."""
    L = len(features_nchw)
    B = features_nchw[0].shape[0]
    D = lin_weights[0].shape[1]

    feats, channels, spatials = [], [], []
    feature_bytes = 0
    for f in features_nchw:
        _, C, H, W = f.shape
        S = H * W
        feats.append(f.reshape(B, C, S))  # free view of contiguous NCHW
        channels.append(C)
        spatials.append(S)
        feature_bytes += B * C * S * 4

    # Lane-friendly stacked parameter slabs (single reshape/stack each; these
    # fuse away under jit). clf_w is (L*D, 1); row i of (L, D) is its i-th slice.
    b_stack = jnp.stack(lin_biases).reshape(L, D)
    wc_stack = clf_w.reshape(L, D)
    clfb = clf_b.reshape(1, 1)

    args = feats + list(lin_weights) + [b_stack, wc_stack, clfb]

    in_specs = [pl.BlockSpec(memory_space=pltpu.MemorySpace.VMEM) for _ in args]
    out_specs = pl.BlockSpec(memory_space=pltpu.MemorySpace.VMEM)

    kernel = functools.partial(
        _gtg_ll_kernel,
        num_features=L,
        batch=B,
        interm_dim=D,
        channels=tuple(channels),
        spatials=tuple(spatials),
    )

    return pl.pallas_call(
        kernel,
        out_shape=jax.ShapeDtypeStruct((B, 1), jnp.float32),
        in_specs=in_specs,
        out_specs=out_specs,
        compiler_params=pltpu.CompilerParams(
            vmem_limit_bytes=_vmem_limit_bytes(feature_bytes),
        ),
    )(*args)


def _reference_forward(features_nchw, lin_weights, lin_biases, clf_w, clf_b):
    outs = []
    for f, w, b in zip(features_nchw, lin_weights, lin_biases):
        pooled = jnp.mean(f, axis=(2, 3))                 # AvgPool2d(e_d) + view
        outs.append(jnp.maximum(pooled @ w + b, 0.0))     # Linear + ReLU
    cat = jnp.concatenate(outs, axis=1)
    return cat @ clf_w + clf_b


if __name__ == "__main__":
    # Synthetic module config (matches __init__ signature):
    #   feature_sizes = [32, 16, 8], num_channels = [4, 8, 16], interm_dim = 32
    feature_sizes = [32, 16, 8]
    num_channels = [4, 8, 16]
    interm_dim = 32
    batch = 2

    key = jax.random.PRNGKey(0)
    keys = jax.random.split(key, 3 * len(num_channels) + 2)

    # Deterministic inputs (NCHW, as PyTorch would provide).
    features = []
    for i, (c, e) in enumerate(zip(num_channels, feature_sizes)):
        features.append(
            jax.random.normal(keys[i], (batch, c, e, e), dtype=jnp.float32)
        )

    # Deterministic synthetic parameters (stored as (in, out); applied as x @ W).
    lin_weights, lin_biases = [], []
    ko = len(num_channels)
    for i, c in enumerate(num_channels):
        lin_weights.append(
            0.1 * jax.random.normal(keys[ko + 2 * i], (c, interm_dim), dtype=jnp.float32)
        )
        lin_biases.append(
            0.1 * jax.random.normal(keys[ko + 2 * i + 1], (interm_dim,), dtype=jnp.float32)
        )
    clf_w = 0.1 * jax.random.normal(
        keys[-2], (interm_dim * len(num_channels), 1), dtype=jnp.float32
    )
    clf_b = 0.1 * jax.random.normal(keys[-1], (1,), dtype=jnp.float32)

    fwd = jax.jit(module_ll_forward)
    out = fwd(features, lin_weights, lin_biases, clf_w, clf_b)
    out = jax.block_until_ready(out)

    ref = _reference_forward(features, lin_weights, lin_biases, clf_w, clf_b)
    assert out.shape == (batch, 1), out.shape
    assert jnp.allclose(out, ref, atol=1e-4, rtol=1e-4), (out, ref)

    print("KERNEL_OK")
</pallas_src>

<mosaic_0001>
module attributes {stable_mosaic.version = 11 : i64} {
  func.func @_gtg_ll_kernel(%arg0: memref<2x4x1024xf32, #tpu.memory_space<vmem>>, %arg1: memref<2x8x256xf32, #tpu.memory_space<vmem>>, %arg2: memref<2x16x64xf32, #tpu.memory_space<vmem>>, %arg3: memref<4x32xf32, #tpu.memory_space<vmem>>, %arg4: memref<8x32xf32, #tpu.memory_space<vmem>>, %arg5: memref<16x32xf32, #tpu.memory_space<vmem>>, %arg6: memref<3x32xf32, #tpu.memory_space<vmem>>, %arg7: memref<3x32xf32, #tpu.memory_space<vmem>>, %arg8: memref<1x1xf32, #tpu.memory_space<vmem>>, %arg9: memref<2x1xf32, #tpu.memory_space<vmem>>) attributes {dimension_semantics = [], scalar_prefetch = 0 : i64, scratch_operands = 0 : i64, tpu.core_type = #tpu.core_type<tc>} {
    %cst = arith.constant 0.000000e+00 : f32
    %0 = vector.broadcast %cst : f32 to vector<2x1xf32>
    %c0 = arith.constant 0 : index
    %c0_0 = arith.constant 0 : index
    %c0_1 = arith.constant 0 : index
    %1 = vector.load %arg0[%c0, %c0_0, %c0_1] : memref<2x4x1024xf32, #tpu.memory_space<vmem>>, vector<2x4x1024xf32>
    %cst_2 = arith.constant dense<0.000000e+00> : vector<2x4xf32>
    %2 = vector.multi_reduction <add>, %1, %cst_2 [2] : vector<2x4x1024xf32> to vector<2x4xf32>
    %cst_3 = arith.constant 9.765625E-4 : f32
    %3 = vector.broadcast %cst_3 : f32 to vector<2x4xf32>
    %4 = arith.mulf %2, %3 : vector<2x4xf32>
    %5 = vector.extract_strided_slice %4 {offsets = [0, 0], sizes = [2, 1], strides = [1, 1]} : vector<2x4xf32> to vector<2x1xf32>
    %c0_4 = arith.constant 0 : index
    %c0_5 = arith.constant 0 : index
    %6 = vector.load %arg3[%c0_4, %c0_5] : memref<4x32xf32, #tpu.memory_space<vmem>>, vector<1x32xf32>
    %7 = vector.broadcast %5 : vector<2x1xf32> to vector<2x32xf32>
    %8 = vector.broadcast %6 : vector<1x32xf32> to vector<2x32xf32>
    %9 = arith.mulf %7, %8 : vector<2x32xf32>
    %10 = vector.extract_strided_slice %4 {offsets = [0, 1], sizes = [2, 1], strides = [1, 1]} : vector<2x4xf32> to vector<2x1xf32>
    %c1 = arith.constant 1 : index
    %c0_6 = arith.constant 0 : index
    %11 = vector.load %arg3[%c1, %c0_6] : memref<4x32xf32, #tpu.memory_space<vmem>>, vector<1x32xf32>
    %12 = vector.broadcast %10 : vector<2x1xf32> to vector<2x32xf32>
    %13 = vector.broadcast %11 : vector<1x32xf32> to vector<2x32xf32>
    %14 = arith.mulf %12, %13 : vector<2x32xf32>
    %15 = vector.extract_strided_slice %4 {offsets = [0, 2], sizes = [2, 1], strides = [1, 1]} : vector<2x4xf32> to vector<2x1xf32>
    %c2 = arith.constant 2 : index
    %c0_7 = arith.constant 0 : index
    %16 = vector.load %arg3[%c2, %c0_7] : memref<4x32xf32, #tpu.memory_space<vmem>>, vector<1x32xf32>
    %17 = vector.broadcast %15 : vector<2x1xf32> to vector<2x32xf32>
    %18 = vector.broadcast %16 : vector<1x32xf32> to vector<2x32xf32>
    %19 = arith.mulf %17, %18 : vector<2x32xf32>
    %20 = vector.extract_strided_slice %4 {offsets = [0, 3], sizes = [2, 1], strides = [1, 1]} : vector<2x4xf32> to vector<2x1xf32>
    %c3 = arith.constant 3 : index
    %c0_8 = arith.constant 0 : index
    %21 = vector.load %arg3[%c3, %c0_8] : memref<4x32xf32, #tpu.memory_space<vmem>>, vector<1x32xf32>
    %22 = vector.broadcast %20 : vector<2x1xf32> to vector<2x32xf32>
    %23 = vector.broadcast %21 : vector<1x32xf32> to vector<2x32xf32>
    %24 = arith.mulf %22, %23 : vector<2x32xf32>
    %25 = arith.addf %9, %14 : vector<2x32xf32>
    %26 = arith.addf %19, %24 : vector<2x32xf32>
    %27 = arith.addf %25, %26 : vector<2x32xf32>
    %c0_9 = arith.constant 0 : index
    %c0_10 = arith.constant 0 : index
    %28 = vector.load %arg6[%c0_9, %c0_10] : memref<3x32xf32, #tpu.memory_space<vmem>>, vector<1x32xf32>
    %29 = vector.broadcast %28 : vector<1x32xf32> to vector<2x32xf32>
    %30 = arith.addf %27, %29 : vector<2x32xf32>
    %cst_11 = arith.constant 0.000000e+00 : f32
    %31 = vector.broadcast %cst_11 : f32 to vector<2x32xf32>
    %32 = arith.maximumf %30, %31 : vector<2x32xf32>
    %c0_12 = arith.constant 0 : index
    %c0_13 = arith.constant 0 : index
    %33 = vector.load %arg7[%c0_12, %c0_13] : memref<3x32xf32, #tpu.memory_space<vmem>>, vector<1x32xf32>
    %34 = vector.broadcast %33 : vector<1x32xf32> to vector<2x32xf32>
    %35 = arith.mulf %32, %34 : vector<2x32xf32>
    %cst_14 = arith.constant dense<0.000000e+00> : vector<2xf32>
    %36 = vector.multi_reduction <add>, %35, %cst_14 [1] : vector<2x32xf32> to vector<2xf32>
    %37 = vector.shape_cast %36 : vector<2xf32> to vector<2x1xf32>
    %38 = arith.addf %0, %37 : vector<2x1xf32>
    %c0_15 = arith.constant 0 : index
    %c0_16 = arith.constant 0 : index
    %c0_17 = arith.constant 0 : index
    %39 = vector.load %arg1[%c0_15, %c0_16, %c0_17] : memref<2x8x256xf32, #tpu.memory_space<vmem>>, vector<2x8x256xf32>
    %cst_18 = arith.constant dense<0.000000e+00> : vector<2x8xf32>
    %40 = vector.multi_reduction <add>, %39, %cst_18 [2] : vector<2x8x256xf32> to vector<2x8xf32>
    %cst_19 = arith.constant 3.906250e-03 : f32
    %41 = vector.broadcast %cst_19 : f32 to vector<2x8xf32>
    %42 = arith.mulf %40, %41 : vector<2x8xf32>
    %43 = vector.extract_strided_slice %42 {offsets = [0, 0], sizes = [2, 1], strides = [1, 1]} : vector<2x8xf32> to vector<2x1xf32>
    %c0_20 = arith.constant 0 : index
    %c0_21 = arith.constant 0 : index
    %44 = vector.load %arg4[%c0_20, %c0_21] : memref<8x32xf32, #tpu.memory_space<vmem>>, vector<1x32xf32>
    %45 = vector.broadcast %43 : vector<2x1xf32> to vector<2x32xf32>
    %46 = vector.broadcast %44 : vector<1x32xf32> to vector<2x32xf32>
    %47 = arith.mulf %45, %46 : vector<2x32xf32>
    %48 = vector.extract_strided_slice %42 {offsets = [0, 1], sizes = [2, 1], strides = [1, 1]} : vector<2x8xf32> to vector<2x1xf32>
    %c1_22 = arith.constant 1 : index
    %c0_23 = arith.constant 0 : index
    %49 = vector.load %arg4[%c1_22, %c0_23] : memref<8x32xf32, #tpu.memory_space<vmem>>, vector<1x32xf32>
    %50 = vector.broadcast %48 : vector<2x1xf32> to vector<2x32xf32>
    %51 = vector.broadcast %49 : vector<1x32xf32> to vector<2x32xf32>
    %52 = arith.mulf %50, %51 : vector<2x32xf32>
    %53 = vector.extract_strided_slice %42 {offsets = [0, 2], sizes = [2, 1], strides = [1, 1]} : vector<2x8xf32> to vector<2x1xf32>
    %c2_24 = arith.constant 2 : index
    %c0_25 = arith.constant 0 : index
    %54 = vector.load %arg4[%c2_24, %c0_25] : memref<8x32xf32, #tpu.memory_space<vmem>>, vector<1x32xf32>
    %55 = vector.broadcast %53 : vector<2x1xf32> to vector<2x32xf32>
    %56 = vector.broadcast %54 : vector<1x32xf32> to vector<2x32xf32>
    %57 = arith.mulf %55, %56 : vector<2x32xf32>
    %58 = vector.extract_strided_slice %42 {offsets = [0, 3], sizes = [2, 1], strides = [1, 1]} : vector<2x8xf32> to vector<2x1xf32>
    %c3_26 = arith.constant 3 : index
    %c0_27 = arith.constant 0 : index
    %59 = vector.load %arg4[%c3_26, %c0_27] : memref<8x32xf32, #tpu.memory_space<vmem>>, vector<1x32xf32>
    %60 = vector.broadcast %58 : vector<2x1xf32> to vector<2x32xf32>
    %61 = vector.broadcast %59 : vector<1x32xf32> to vector<2x32xf32>
    %62 = arith.mulf %60, %61 : vector<2x32xf32>
    %63 = vector.extract_strided_slice %42 {offsets = [0, 4], sizes = [2, 1], strides = [1, 1]} : vector<2x8xf32> to vector<2x1xf32>
    %c4 = arith.constant 4 : index
    %c0_28 = arith.constant 0 : index
    %64 = vector.load %arg4[%c4, %c0_28] : memref<8x32xf32, #tpu.memory_space<vmem>>, vector<1x32xf32>
    %65 = vector.broadcast %63 : vector<2x1xf32> to vector<2x32xf32>
    %66 = vector.broadcast %64 : vector<1x32xf32> to vector<2x32xf32>
    %67 = arith.mulf %65, %66 : vector<2x32xf32>
    %68 = vector.extract_strided_slice %42 {offsets = [0, 5], sizes = [2, 1], strides = [1, 1]} : vector<2x8xf32> to vector<2x1xf32>
    %c5 = arith.constant 5 : index
    %c0_29 = arith.constant 0 : index
    %69 = vector.load %arg4[%c5, %c0_29] : memref<8x32xf32, #tpu.memory_space<vmem>>, vector<1x32xf32>
    %70 = vector.broadcast %68 : vector<2x1xf32> to vector<2x32xf32>
    %71 = vector.broadcast %69 : vector<1x32xf32> to vector<2x32xf32>
    %72 = arith.mulf %70, %71 : vector<2x32xf32>
    %73 = vector.extract_strided_slice %42 {offsets = [0, 6], sizes = [2, 1], strides = [1, 1]} : vector<2x8xf32> to vector<2x1xf32>
    %c6 = arith.constant 6 : index
    %c0_30 = arith.constant 0 : index
    %74 = vector.load %arg4[%c6, %c0_30] : memref<8x32xf32, #tpu.memory_space<vmem>>, vector<1x32xf32>
    %75 = vector.broadcast %73 : vector<2x1xf32> to vector<2x32xf32>
    %76 = vector.broadcast %74 : vector<1x32xf32> to vector<2x32xf32>
    %77 = arith.mulf %75, %76 : vector<2x32xf32>
    %78 = vector.extract_strided_slice %42 {offsets = [0, 7], sizes = [2, 1], strides = [1, 1]} : vector<2x8xf32> to vector<2x1xf32>
    %c7 = arith.constant 7 : index
    %c0_31 = arith.constant 0 : index
    %79 = vector.load %arg4[%c7, %c0_31] : memref<8x32xf32, #tpu.memory_space<vmem>>, vector<1x32xf32>
    %80 = vector.broadcast %78 : vector<2x1xf32> to vector<2x32xf32>
    %81 = vector.broadcast %79 : vector<1x32xf32> to vector<2x32xf32>
    %82 = arith.mulf %80, %81 : vector<2x32xf32>
    %83 = arith.addf %47, %52 : vector<2x32xf32>
    %84 = arith.addf %57, %62 : vector<2x32xf32>
    %85 = arith.addf %67, %72 : vector<2x32xf32>
    %86 = arith.addf %77, %82 : vector<2x32xf32>
    %87 = arith.addf %83, %84 : vector<2x32xf32>
    %88 = arith.addf %85, %86 : vector<2x32xf32>
    %89 = arith.addf %87, %88 : vector<2x32xf32>
    %c1_32 = arith.constant 1 : index
    %c0_33 = arith.constant 0 : index
    %90 = vector.load %arg6[%c1_32, %c0_33] : memref<3x32xf32, #tpu.memory_space<vmem>>, vector<1x32xf32>
    %91 = vector.broadcast %90 : vector<1x32xf32> to vector<2x32xf32>
    %92 = arith.addf %89, %91 : vector<2x32xf32>
    %cst_34 = arith.constant 0.000000e+00 : f32
    %93 = vector.broadcast %cst_34 : f32 to vector<2x32xf32>
    %94 = arith.maximumf %92, %93 : vector<2x32xf32>
    %c1_35 = arith.constant 1 : index
    %c0_36 = arith.constant 0 : index
    %95 = vector.load %arg7[%c1_35, %c0_36] : memref<3x32xf32, #tpu.memory_space<vmem>>, vector<1x32xf32>
    %96 = vector.broadcast %95 : vector<1x32xf32> to vector<2x32xf32>
    %97 = arith.mulf %94, %96 : vector<2x32xf32>
    %cst_37 = arith.constant dense<0.000000e+00> : vector<2xf32>
    %98 = vector.multi_reduction <add>, %97, %cst_37 [1] : vector<2x32xf32> to vector<2xf32>
    %99 = vector.shape_cast %98 : vector<2xf32> to vector<2x1xf32>
    %100 = arith.addf %38, %99 : vector<2x1xf32>
    %c0_38 = arith.constant 0 : index
    %c0_39 = arith.constant 0 : index
    %c0_40 = arith.constant 0 : index
    %101 = vector.load %arg2[%c0_38, %c0_39, %c0_40] : memref<2x16x64xf32, #tpu.memory_space<vmem>>, vector<2x16x64xf32>
    %cst_41 = arith.constant dense<0.000000e+00> : vector<2x16xf32>
    %102 = vector.multi_reduction <add>, %101, %cst_41 [2] : vector<2x16x64xf32> to vector<2x16xf32>
    %cst_42 = arith.constant 1.562500e-02 : f32
    %103 = vector.broadcast %cst_42 : f32 to vector<2x16xf32>
    %104 = arith.mulf %102, %103 : vector<2x16xf32>
    %105 = vector.extract_strided_slice %104 {offsets = [0, 0], sizes = [2, 1], strides = [1, 1]} : vector<2x16xf32> to vector<2x1xf32>
    %c0_43 = arith.constant 0 : index
    %c0_44 = arith.constant 0 : index
    %106 = vector.load %arg5[%c0_43, %c0_44] : memref<16x32xf32, #tpu.memory_space<vmem>>, vector<1x32xf32>
    %107 = vector.broadcast %105 : vector<2x1xf32> to vector<2x32xf32>
    %108 = vector.broadcast %106 : vector<1x32xf32> to vector<2x32xf32>
    %109 = arith.mulf %107, %108 : vector<2x32xf32>
    %110 = vector.extract_strided_slice %104 {offsets = [0, 1], sizes = [2, 1], strides = [1, 1]} : vector<2x16xf32> to vector<2x1xf32>
    %c1_45 = arith.constant 1 : index
    %c0_46 = arith.constant 0 : index
    %111 = vector.load %arg5[%c1_45, %c0_46] : memref<16x32xf32, #tpu.memory_space<vmem>>, vector<1x32xf32>
    %112 = vector.broadcast %110 : vector<2x1xf32> to vector<2x32xf32>
    %113 = vector.broadcast %111 : vector<1x32xf32> to vector<2x32xf32>
    %114 = arith.mulf %112, %113 : vector<2x32xf32>
    %115 = vector.extract_strided_slice %104 {offsets = [0, 2], sizes = [2, 1], strides = [1, 1]} : vector<2x16xf32> to vector<2x1xf32>
    %c2_47 = arith.constant 2 : index
    %c0_48 = arith.constant 0 : index
    %116 = vector.load %arg5[%c2_47, %c0_48] : memref<16x32xf32, #tpu.memory_space<vmem>>, vector<1x32xf32>
    %117 = vector.broadcast %115 : vector<2x1xf32> to vector<2x32xf32>
    %118 = vector.broadcast %116 : vector<1x32xf32> to vector<2x32xf32>
    %119 = arith.mulf %117, %118 : vector<2x32xf32>
    %120 = vector.extract_strided_slice %104 {offsets = [0, 3], sizes = [2, 1], strides = [1, 1]} : vector<2x16xf32> to vector<2x1xf32>
    %c3_49 = arith.constant 3 : index
    %c0_50 = arith.constant 0 : index
    %121 = vector.load %arg5[%c3_49, %c0_50] : memref<16x32xf32, #tpu.memory_space<vmem>>, vector<1x32xf32>
    %122 = vector.broadcast %120 : vector<2x1xf32> to vector<2x32xf32>
    %123 = vector.broadcast %121 : vector<1x32xf32> to vector<2x32xf32>
    %124 = arith.mulf %122, %123 : vector<2x32xf32>
    %125 = vector.extract_strided_slice %104 {offsets = [0, 4], sizes = [2, 1], strides = [1, 1]} : vector<2x16xf32> to vector<2x1xf32>
    %c4_51 = arith.constant 4 : index
    %c0_52 = arith.constant 0 : index
    %126 = vector.load %arg5[%c4_51, %c0_52] : memref<16x32xf32, #tpu.memory_space<vmem>>, vector<1x32xf32>
    %127 = vector.broadcast %125 : vector<2x1xf32> to vector<2x32xf32>
    %128 = vector.broadcast %126 : vector<1x32xf32> to vector<2x32xf32>
    %129 = arith.mulf %127, %128 : vector<2x32xf32>
    %130 = vector.extract_strided_slice %104 {offsets = [0, 5], sizes = [2, 1], strides = [1, 1]} : vector<2x16xf32> to vector<2x1xf32>
    %c5_53 = arith.constant 5 : index
    %c0_54 = arith.constant 0 : index
    %131 = vector.load %arg5[%c5_53, %c0_54] : memref<16x32xf32, #tpu.memory_space<vmem>>, vector<1x32xf32>
    %132 = vector.broadcast %130 : vector<2x1xf32> to vector<2x32xf32>
    %133 = vector.broadcast %131 : vector<1x32xf32> to vector<2x32xf32>
    %134 = arith.mulf %132, %133 : vector<2x32xf32>
    %135 = vector.extract_strided_slice %104 {offsets = [0, 6], sizes = [2, 1], strides = [1, 1]} : vector<2x16xf32> to vector<2x1xf32>
    %c6_55 = arith.constant 6 : index
    %c0_56 = arith.constant 0 : index
    %136 = vector.load %arg5[%c6_55, %c0_56] : memref<16x32xf32, #tpu.memory_space<vmem>>, vector<1x32xf32>
    %137 = vector.broadcast %135 : vector<2x1xf32> to vector<2x32xf32>
    %138 = vector.broadcast %136 : vector<1x32xf32> to vector<2x32xf32>
    %139 = arith.mulf %137, %138 : vector<2x32xf32>
    %140 = vector.extract_strided_slice %104 {offsets = [0, 7], sizes = [2, 1], strides = [1, 1]} : vector<2x16xf32> to vector<2x1xf32>
    %c7_57 = arith.constant 7 : index
    %c0_58 = arith.constant 0 : index
    %141 = vector.load %arg5[%c7_57, %c0_58] : memref<16x32xf32, #tpu.memory_space<vmem>>, vector<1x32xf32>
    %142 = vector.broadcast %140 : vector<2x1xf32> to vector<2x32xf32>
    %143 = vector.broadcast %141 : vector<1x32xf32> to vector<2x32xf32>
    %144 = arith.mulf %142, %143 : vector<2x32xf32>
    %145 = vector.extract_strided_slice %104 {offsets = [0, 8], sizes = [2, 1], strides = [1, 1]} : vector<2x16xf32> to vector<2x1xf32>
    %c8 = arith.constant 8 : index
    %c0_59 = arith.constant 0 : index
    %146 = vector.load %arg5[%c8, %c0_59] : memref<16x32xf32, #tpu.memory_space<vmem>>, vector<1x32xf32>
    %147 = vector.broadcast %145 : vector<2x1xf32> to vector<2x32xf32>
    %148 = vector.broadcast %146 : vector<1x32xf32> to vector<2x32xf32>
    %149 = arith.mulf %147, %148 : vector<2x32xf32>
    %150 = vector.extract_strided_slice %104 {offsets = [0, 9], sizes = [2, 1], strides = [1, 1]} : vector<2x16xf32> to vector<2x1xf32>
    %c9 = arith.constant 9 : index
    %c0_60 = arith.constant 0 : index
    %151 = vector.load %arg5[%c9, %c0_60] : memref<16x32xf32, #tpu.memory_space<vmem>>, vector<1x32xf32>
    %152 = vector.broadcast %150 : vector<2x1xf32> to vector<2x32xf32>
    %153 = vector.broadcast %151 : vector<1x32xf32> to vector<2x32xf32>
    %154 = arith.mulf %152, %153 : vector<2x32xf32>
    %155 = vector.extract_strided_slice %104 {offsets = [0, 10], sizes = [2, 1], strides = [1, 1]} : vector<2x16xf32> to vector<2x1xf32>
    %c10 = arith.constant 10 : index
    %c0_61 = arith.constant 0 : index
    %156 = vector.load %arg5[%c10, %c0_61] : memref<16x32xf32, #tpu.memory_space<vmem>>, vector<1x32xf32>
    %157 = vector.broadcast %155 : vector<2x1xf32> to vector<2x32xf32>
    %158 = vector.broadcast %156 : vector<1x32xf32> to vector<2x32xf32>
    %159 = arith.mulf %157, %158 : vector<2x32xf32>
    %160 = vector.extract_strided_slice %104 {offsets = [0, 11], sizes = [2, 1], strides = [1, 1]} : vector<2x16xf32> to vector<2x1xf32>
    %c11 = arith.constant 11 : index
    %c0_62 = arith.constant 0 : index
    %161 = vector.load %arg5[%c11, %c0_62] : memref<16x32xf32, #tpu.memory_space<vmem>>, vector<1x32xf32>
    %162 = vector.broadcast %160 : vector<2x1xf32> to vector<2x32xf32>
    %163 = vector.broadcast %161 : vector<1x32xf32> to vector<2x32xf32>
    %164 = arith.mulf %162, %163 : vector<2x32xf32>
    %165 = vector.extract_strided_slice %104 {offsets = [0, 12], sizes = [2, 1], strides = [1, 1]} : vector<2x16xf32> to vector<2x1xf32>
    %c12 = arith.constant 12 : index
    %c0_63 = arith.constant 0 : index
    %166 = vector.load %arg5[%c12, %c0_63] : memref<16x32xf32, #tpu.memory_space<vmem>>, vector<1x32xf32>
    %167 = vector.broadcast %165 : vector<2x1xf32> to vector<2x32xf32>
    %168 = vector.broadcast %166 : vector<1x32xf32> to vector<2x32xf32>
    %169 = arith.mulf %167, %168 : vector<2x32xf32>
    %170 = vector.extract_strided_slice %104 {offsets = [0, 13], sizes = [2, 1], strides = [1, 1]} : vector<2x16xf32> to vector<2x1xf32>
    %c13 = arith.constant 13 : index
    %c0_64 = arith.constant 0 : index
    %171 = vector.load %arg5[%c13, %c0_64] : memref<16x32xf32, #tpu.memory_space<vmem>>, vector<1x32xf32>
    %172 = vector.broadcast %170 : vector<2x1xf32> to vector<2x32xf32>
    %173 = vector.broadcast %171 : vector<1x32xf32> to vector<2x32xf32>
    %174 = arith.mulf %172, %173 : vector<2x32xf32>
    %175 = vector.extract_strided_slice %104 {offsets = [0, 14], sizes = [2, 1], strides = [1, 1]} : vector<2x16xf32> to vector<2x1xf32>
    %c14 = arith.constant 14 : index
    %c0_65 = arith.constant 0 : index
    %176 = vector.load %arg5[%c14, %c0_65] : memref<16x32xf32, #tpu.memory_space<vmem>>, vector<1x32xf32>
    %177 = vector.broadcast %175 : vector<2x1xf32> to vector<2x32xf32>
    %178 = vector.broadcast %176 : vector<1x32xf32> to vector<2x32xf32>
    %179 = arith.mulf %177, %178 : vector<2x32xf32>
    %180 = vector.extract_strided_slice %104 {offsets = [0, 15], sizes = [2, 1], strides = [1, 1]} : vector<2x16xf32> to vector<2x1xf32>
    %c15 = arith.constant 15 : index
    %c0_66 = arith.constant 0 : index
    %181 = vector.load %arg5[%c15, %c0_66] : memref<16x32xf32, #tpu.memory_space<vmem>>, vector<1x32xf32>
    %182 = vector.broadcast %180 : vector<2x1xf32> to vector<2x32xf32>
    %183 = vector.broadcast %181 : vector<1x32xf32> to vector<2x32xf32>
    %184 = arith.mulf %182, %183 : vector<2x32xf32>
    %185 = arith.addf %109, %114 : vector<2x32xf32>
    %186 = arith.addf %119, %124 : vector<2x32xf32>
    %187 = arith.addf %129, %134 : vector<2x32xf32>
    %188 = arith.addf %139, %144 : vector<2x32xf32>
    %189 = arith.addf %149, %154 : vector<2x32xf32>
    %190 = arith.addf %159, %164 : vector<2x32xf32>
    %191 = arith.addf %169, %174 : vector<2x32xf32>
    %192 = arith.addf %179, %184 : vector<2x32xf32>
    %193 = arith.addf %185, %186 : vector<2x32xf32>
    %194 = arith.addf %187, %188 : vector<2x32xf32>
    %195 = arith.addf %189, %190 : vector<2x32xf32>
    %196 = arith.addf %191, %192 : vector<2x32xf32>
    %197 = arith.addf %193, %194 : vector<2x32xf32>
    %198 = arith.addf %195, %196 : vector<2x32xf32>
    %199 = arith.addf %197, %198 : vector<2x32xf32>
    %c2_67 = arith.constant 2 : index
    %c0_68 = arith.constant 0 : index
    %200 = vector.load %arg6[%c2_67, %c0_68] : memref<3x32xf32, #tpu.memory_space<vmem>>, vector<1x32xf32>
    %201 = vector.broadcast %200 : vector<1x32xf32> to vector<2x32xf32>
    %202 = arith.addf %199, %201 : vector<2x32xf32>
    %cst_69 = arith.constant 0.000000e+00 : f32
    %203 = vector.broadcast %cst_69 : f32 to vector<2x32xf32>
    %204 = arith.maximumf %202, %203 : vector<2x32xf32>
    %c2_70 = arith.constant 2 : index
    %c0_71 = arith.constant 0 : index
    %205 = vector.load %arg7[%c2_70, %c0_71] : memref<3x32xf32, #tpu.memory_space<vmem>>, vector<1x32xf32>
    %206 = vector.broadcast %205 : vector<1x32xf32> to vector<2x32xf32>
    %207 = arith.mulf %204, %206 : vector<2x32xf32>
    %cst_72 = arith.constant dense<0.000000e+00> : vector<2xf32>
    %208 = vector.multi_reduction <add>, %207, %cst_72 [1] : vector<2x32xf32> to vector<2xf32>
    %209 = vector.shape_cast %208 : vector<2xf32> to vector<2x1xf32>
    %210 = arith.addf %100, %209 : vector<2x1xf32>
    %c0_73 = arith.constant 0 : index
    %c0_74 = arith.constant 0 : index
    %211 = vector.load %arg8[%c0_73, %c0_74] : memref<1x1xf32, #tpu.memory_space<vmem>>, vector<1x1xf32>
    %212 = vector.broadcast %211 : vector<1x1xf32> to vector<2x1xf32>
    %213 = arith.addf %210, %212 : vector<2x1xf32>
    %c0_75 = arith.constant 0 : index
    %c0_76 = arith.constant 0 : index
    %214 = vector.load %arg9[%c0_75, %c0_76] : memref<2x1xf32, #tpu.memory_space<vmem>>, vector<2x1xf32>
    tpu.vector_store %arg9[%c0_75, %c0_76], %213 {strides = array<i32>} : memref<2x1xf32, #tpu.memory_space<vmem>>, vector<2x1xf32>,
    return
  }
}

</mosaic_0001>

<bundles_post_ra>
// kernel: module_ll_forward.1
= control target key start
LH: loop header
LB: loop body
LE: loop exit
PB: predicated region body
PF: predicated region fallthrough
CT: control target
= control target key end

     0   :  { %vm66_vm0 = vcmask 1043456   ;;  %v2004_v59 = vmov 0   ;;  %vm1001_vm1 = vcmask 523264   ;;  %vm408_vm2 = vcmask 130112   ;;  %s3229_s3 = inlined_call_operand.vmem [shape: f32[4,32], index: 3, kind: input, shape index: {}]   ;;  %s3230_s0 = inlined_call_operand.vmem [shape: f32[2,4,1024], index: 0, kind: input, shape index: {}]   ;;  %s3231_s6 = inlined_call_operand.vmem [shape: f32[3,32], index: 6, kind: input, shape index: {}]   ;;  %s3232_s7 = inlined_call_operand.vmem [shape: f32[3,32], index: 7, kind: input, shape index: {}]   ;;  %s3233_s1 = inlined_call_operand.vmem [shape: f32[2,8,256], index: 1, kind: input, shape index: {}]   ;;  %s3234_s4 = inlined_call_operand.vmem [shape: f32[8,32], index: 4, kind: input, shape index: {}]   ;;  %s3235_s2 = inlined_call_operand.vmem [shape: f32[2,16,64], index: 2, kind: input, shape index: {}]   ;;  %s3236_s5 = inlined_call_operand.vmem [shape: f32[16,32], index: 5, kind: input, shape index: {}]   ;;  %s3237_s8 = inlined_call_operand.<no memory space> [shape: f32[1,1], index: 8, kind: input, shape index: {}]   ;;  %s3238_s9 = inlined_call_operand.vmem [shape: f32[2,1], index: 9, kind: output, shape index: {}]  }
   0x1   :  { %v2058_v0 = vld [vmem:[%s3229_s3] ss:$0 sm:$0xff]  ;;  %v35_v2 = vld [vmem:[%s3230_s0 + $0x8] sm:$0xff]  ;;  %v36_v5 = vld [vmem:[%s3230_s0 + $0x10] sm:$0xff]  ;;  %1994 = vset.pattern.permute.xlu1 %v2004_v59  ;;  %1995 = vset.pattern.permute.xlu0 %v2004_v59  ;;  %vm415_vm3 = vcmask 195712   ;;  %vm422_vm4 = vcmask 261312  }
   0x2   :  { %v34_v1 = vld [vmem:[%s3230_s0] sm:$0xff]  ;;  %118 = vbcast.lane.b32.xlu1 %v2058_v0, 256  ;;  %v51_v6 = vcombine.high %v35_v2, %v35_v2  ;;  %v39_v8 = vld [vmem:[%s3230_s0 + $0x28] sm:$0xff]  ;;  %v70_v10 = vsel %vm66_vm0, %v35_v2, 0.0  ;;  %v52_v13 = vcombine.high %v36_v5, %v36_v5  ;;  %v40_v15 = vld [vmem:[%s3230_s0 + $0x30] sm:$0xff]  ;;  %v74_v22 = vsel %vm66_vm0, %v36_v5, 0.0 }
   0x3   :  { %v50_v3 = vcombine.high %v34_v1, %v34_v1  ;;  %v67_v4 = vsel %vm66_vm0, %v34_v1, 0.0  ;;  %v38_v7 = vld [vmem:[%s3230_s0 + $0x20] sm:$0xff]  ;;  %v55_v16 = vcombine.high %v39_v8, %v39_v8  ;;  %v37_v18 = vld [vmem:[%s3230_s0 + $0x18] sm:$0xff]  ;;  %v87_v21 = vsel %vm66_vm0, %v39_v8, 0.0  ;;  %v452_v53 = vld [vmem:[%s3233_s1 + $0x8] sm:$0xff] }
   0x4   :  { %v54_v11 = vcombine.high %v38_v7, %v38_v7  ;;  %v72_v14 = vsel %vm66_vm0, %v51_v6, 0.0  ;;  %v84_v17 = vsel %vm66_vm0, %v38_v7, 0.0  ;;  %v56_v25 = vcombine.high %v40_v15, %v40_v15  ;;  %v41_v29 = vld [vmem:[%s3230_s0 + $0x38] sm:$0xff]  ;;  %v1959_v31 = vld [vmem:[%s3229_s3 + $0x1] ss:$0 sm:$0xff]  ;;  %v453_v55 = vld [vmem:[%s3233_s1 + $0x10] sm:$0xff] }
   0x5   :  { %v68_v9 = vsel %vm66_vm0, %v50_v3, 0.0  ;;  %v89_v26 = vsel %vm66_vm0, %v55_v16, 0.0  ;;  %v53_v27 = vcombine.high %v37_v18, %v37_v18  ;;  %v76_v28 = vsel %vm66_vm0, %v52_v13, 0.0  ;;  %v1960_v48 = vld [vmem:[%s3229_s3 + $0x2] ss:$0 sm:$0xff]  ;;  %v454_v56 = vld [vmem:[%s3233_s1 + $0x18] sm:$0xff] }
   0x6   :  { %v69_v12 = vadd.f32 %v68_v9, %v67_v4  ;;  %122 = vbcast.lane.b32.xlu1 %v2058_v0, 264  ;;  %v85_v20 = vsel %vm66_vm0, %v54_v11, 0.0  ;;  %v91_v33 = vsel %vm66_vm0, %v40_v15, 0.0  ;;  %v78_v34 = vsel %vm66_vm0, %v37_v18, 0.0  ;;  %v1961_v49 = vld [vmem:[%s3229_s3 + $0x3] ss:$0 sm:$0xff] }
   0x7   :  { %v86_v23 = vadd.f32 %v85_v20, %v84_v17  ;;  %v57_v37 = vcombine.high %v41_v29, %v41_v29  ;;  %v93_v38 = vsel %vm66_vm0, %v56_v25, 0.0  ;;  %v80_v39 = vsel %vm66_vm0, %v53_v27, 0.0  ;;  %v1962_v50 = vld [vmem:[%s3231_s6] ss:$0 sm:$0xff]  ;;  %v1965_v60 = vld [vmem:[%s3234_s4 + $0x1] ss:$0 sm:$0xff] }
   0x8   :  { %v71_v19 = vadd.f32 %v70_v10, %v69_v12  ;;  %v95_v42 = vsel %vm66_vm0, %v41_v29, 0.0  ;;  %v1963_v51 = vld [vmem:[%s3232_s7] ss:$0 sm:$0xff]  ;;  %v458_v57 = vadd.f32 %v454_v56, %v453_v55  ;;  %v1966_v61 = vld [vmem:[%s3234_s4 + $0x2] ss:$0 sm:$0xff]  ;;  %v3239_v17 = vlaneseq }
   0x9   :  { %v88_v30 = vadd.f32 %v87_v21, %v86_v23  ;;  %v97_v45 = vsel %vm66_vm0, %v57_v37, 0.0  ;;  %v451_v52 = vld [vmem:[%s3233_s1] sm:$0xff]  ;;  %vm443_vm5 = vcmask 1041409   ;;  %vm446_vm6 = vcmask 254976  }
   0xa   :  { %v73_v24 = vadd.f32 %v72_v14, %v71_v19  ;;  %130 = vbcast.lane.b32.xlu1 %v2058_v0, 280  ;;  %v455_v54 = vadd.f32 %v452_v53, %v451_v52  ;;  %v1964_v58 = vld [vmem:[%s3234_s4] ss:$0 sm:$0xff]  ;;  %v1967_v62 = vld [vmem:[%s3234_s4 + $0x3] ss:$0 sm:$0xff]  ;;  %v2186_v20 = vshrl.u32 %v3239_v17, 7 }
   0xb   :  { %v90_v35 = vadd.f32 %v89_v26, %v88_v30  ;;  %v1968_v63 = vld [vmem:[%s3234_s4 + $0x4] ss:$0 sm:$0xff]  ;;  %v1969_v1 = vld [vmem:[%s3234_s4 + $0x5] ss:$0 sm:$0xff]  ;;  %v1970_v3 = vld [vmem:[%s3234_s4 + $0x6] ss:$0 sm:$0xff] }
   0xc   :  { %v75_v32 = vadd.f32 %v74_v22, %v73_v24  ;;  %v1971_v5 = vld [vmem:[%s3234_s4 + $0x7] ss:$0 sm:$0xff]  ;;  %v1972_v8 = vld [vmem:[%s3231_s6 + $0x1] ss:$0 sm:$0xff]  ;;  %3282 = vst [vmem:[#allocation3_spill] sm:$0xff] %v2186_v20  ;;  %v2193_v23 = vsub.s32 0, %v2186_v20 }
   0xd   :  { %v92_v40 = vadd.f32 %v91_v33, %v90_v35  ;;  %v1973_v10 = vld [vmem:[%s3232_s7 + $0x1] ss:$0 sm:$0xff]  ;;  %v2196_v24 = vsub.s32 1, %v2186_v20  ;;  %v2199_v25 = vsub.s32 2, %v2186_v20  ;;  %v2202_v26 = vsub.s32 3, %v2186_v20 }
   0xe   :  { %v77_v36 = vadd.f32 %v76_v28, %v75_v32  ;;  %159 = vbcast.lane.b32.xlu1 %v1959_v31, 256  ;;  %3283 = vst [vmem:[#allocation4_spill] sm:$0xff] %v2193_v23  ;;  %vm1952_vm7 = vcmask 1024  }
   0xf   :  { %v94_v43 = vadd.f32 %v93_v38, %v92_v40  ;;  %3284 = vst [vmem:[#allocation5_spill] sm:$0xff] %v2196_v24  ;;  %3285 = vst [vmem:[#allocation6_spill] sm:$0xff] %v2199_v25  ;;  %v998_v38 = vld [vmem:[%s3235_s2 + $0x8] sm:$0xff] }
  0x10   :  { %v79_v41 = vadd.f32 %v78_v34, %v77_v36  ;;  %3286 = vst [vmem:[#allocation7_spill] sm:$0xff] %v2202_v26 }
  0x11   :  { %v96_v46 = vadd.f32 %v95_v42, %v94_v43 }
  0x12   :  { %v81_v44 = vadd.f32 %v80_v39, %v79_v41  ;;  %163 = vbcast.lane.b32.xlu1 %v1959_v31, 264  ;;  %v1005_v41 = vsel %vm1001_vm1, %v998_v38, 0.0 }
  0x13   :  { %v98_v47 = vadd.f32 %v97_v45, %v96_v46 }
  0x14   :  { %82 = vadd.xlane.f32.xlu0 %v81_v44 }
  0x16   :  { %167 = vbcast.lane.b32.xlu1 %v1959_v31, 272 }
  0x18   :  { %99 = vadd.xlane.f32.xlu0 %v98_v47 }
  0x1a   :  { %171 = vbcast.lane.b32.xlu1 %v1959_v31, 280 }
  0x1e   :  { %200 = vbcast.lane.b32.xlu1 %v1960_v48, 256 }
  0x22   :  { %208 = vbcast.lane.b32.xlu1 %v1960_v48, 272 }
  0x26   :  { %241 = vbcast.lane.b32.xlu1 %v1961_v49, 256 }
  0x2a   :  { %249 = vbcast.lane.b32.xlu1 %v1961_v49, 272 }
  0x2e   :  { %126 = vbcast.lane.b32.xlu0 %v2058_v0, 272  ;;  %298 = vbcast.lane.b32.xlu1 %v1962_v50, 256 }
  0x32   :  { %204 = vbcast.lane.b32.xlu0 %v1960_v48, 264  ;;  %306 = vbcast.lane.b32.xlu1 %v1962_v50, 272 }
  0x36   :  { %212 = vbcast.lane.b32.xlu0 %v1960_v48, 280  ;;  %339 = vbcast.lane.b32.xlu1 %v1963_v51, 256 }
  0x3a   :  { %245 = vbcast.lane.b32.xlu0 %v1961_v49, 264  ;;  %347 = vbcast.lane.b32.xlu1 %v1963_v51, 272 }
  0x3e   :  { %253 = vbcast.lane.b32.xlu0 %v1961_v49, 280 }
  0x42   :  { %302 = vbcast.lane.b32.xlu0 %v1962_v50, 264 }
  0x46   :  { %310 = vbcast.lane.b32.xlu0 %v1962_v50, 280 }
  0x4a   :  { %343 = vbcast.lane.b32.xlu0 %v1963_v51, 264 }
  0x4e   :  { %351 = vbcast.lane.b32.xlu0 %v1963_v51, 280 }
  0x5e   :  { %456 = vadd.xlane.f32.xlu1 %v455_v54 }
  0x6d   :  { %459 = vadd.xlane.f32.xlu0 %v458_v57  ;;  %v997_v57 = vld [vmem:[%s3235_s2] sm:$0xff] }
  0x6f   :  { %482 = vbcast.lane.b32.xlu1 %v1964_v58, 264 }
  0x73   :  { %486 = vbcast.lane.b32.xlu1 %v1964_v58, 272 }
  0x74   :  { %v2146_v0 = vpop.permute.xlu1 %118 }
  0x77   :  { %519 = vbcast.lane.b32.xlu1 %v1965_v60, 256 }
  0x78   :  { %v2151_v2 = vpop.permute.xlu1 %122 }
  0x7b   :  { %527 = vbcast.lane.b32.xlu1 %v1965_v60, 272 }
  0x7c   :  { %v2156_v4 = vpop.permute.xlu1 %130 }
  0x7f   :  { %560 = vbcast.lane.b32.xlu1 %v1966_v61, 256 }
  0x80   :  { %v2161_v6 = vpop.permute.xlu1 %159 }
  0x83   :  { %478 = vbcast.lane.b32.xlu0 %v1964_v58, 256  ;;  %568 = vbcast.lane.b32.xlu1 %v1966_v61, 272 }
  0x84   :  { %v2163_v7 = vpop.permute.xlu1 %163 }
  0x87   :  { %490 = vbcast.lane.b32.xlu0 %v1964_v58, 280  ;;  %601 = vbcast.lane.b32.xlu1 %v1967_v62, 256 }
  0x88   :  { %v2168_v9 = vpop.permute.xlu1 %167 }
  0x8b   :  { %523 = vbcast.lane.b32.xlu0 %v1965_v60, 264  ;;  %609 = vbcast.lane.b32.xlu1 %v1967_v62, 272 }
  0x8c   :  { %v2173_v11 = vpop.permute.xlu1 %171 }
  0x8f   :  { %531 = vbcast.lane.b32.xlu0 %v1965_v60, 280  ;;  %642 = vbcast.lane.b32.xlu1 %v1968_v63, 256 }
  0x90   :  { %v2175_v13 = vpop.permute.xlu1 %200 }
  0x93   :  { %564 = vbcast.lane.b32.xlu0 %v1966_v61, 264  ;;  %650 = vbcast.lane.b32.xlu1 %v1968_v63, 272 }
  0x94   :  { %v2177_v15 = vpop.permute.xlu1 %208 }
  0x97   :  { %572 = vbcast.lane.b32.xlu0 %v1966_v61, 280  ;;  %683 = vbcast.lane.b32.xlu1 %v1969_v1, 256 }
  0x98   :  { %v2181_v18 = vpop.permute.xlu1 %241 }
  0x9b   :  { %605 = vbcast.lane.b32.xlu0 %v1967_v62, 264  ;;  %691 = vbcast.lane.b32.xlu1 %v1969_v1, 272 }
  0x9c   :  { %v2188_v21 = vpop.permute.xlu1 %249 }
  0x9f   :  { %613 = vbcast.lane.b32.xlu0 %v1967_v62, 280  ;;  %724 = vbcast.lane.b32.xlu1 %v1970_v3, 256 }
  0xa0   :  { %v2216_v32 = vpop.permute.xlu1 %298 }
  0xa1   :  { %v83_v12 = vpop.xlane.xlu0 %82 }
  0xa2   :  { %v101_v27 = vmul.f32 0.0009765625, %v83_v12 }
  0xa3   :  { %646 = vbcast.lane.b32.xlu0 %v1968_v63, 264  ;;  %732 = vbcast.lane.b32.xlu1 %v1970_v3, 272 }
  0xa4   :  { %v2205_v28 = vrot.slane %v101_v27, %v2193_v23  ;;  %v2208_v29 = vrot.slane %v101_v27, %v2196_v24  ;;  %v2211_v30 = vrot.slane %v101_v27, %v2199_v25  ;;  %v2214_v31 = vrot.slane %v101_v27, %v2202_v26  ;;  %v2231_v39 = vpop.permute.xlu1 %306 }
  0xa5   :  { %v100_v14 = vpop.xlane.xlu0 %99 }
  0xa6   :  { %v136_v34 = vmul.f32 %v2146_v0, %v2205_v28  ;;  %v177_v35 = vmul.f32 %v2161_v6, %v2208_v29  ;;  %v218_v36 = vmul.f32 %v2175_v13, %v2211_v30  ;;  %v259_v37 = vmul.f32 %v2181_v18, %v2214_v31 }
  0xa7   :  { %654 = vbcast.lane.b32.xlu0 %v1968_v63, 280  ;;  %765 = vbcast.lane.b32.xlu1 %v1971_v5, 256  ;;  %v220_v45 = vmul.f32 %v2177_v15, %v2211_v30  ;;  %v261_v46 = vmul.f32 %v2188_v21, %v2214_v31  ;;  %v179_v47 = vmul.f32 %v2168_v9, %v2208_v29  ;;  %v102_v52 = vmul.f32 0.0009765625, %v100_v14 }
  0xa8   :  { %v267_v42 = vadd.f32 %v177_v35, %v136_v34  ;;  %v275_v43 = vadd.f32 %v259_v37, %v218_v36  ;;  %v2242_v49 = vpop.permute.xlu1 %339  ;;  %v999_v34 = vld [vmem:[%s3235_s2 + $0x10] sm:$0xff] }
  0xa9   :  { %v2179_v16 = vpop.permute.xlu0 %126  ;;  %v277_v53 = vadd.f32 %v261_v46, %v220_v45  ;;  %v2252_v58 = vrot.slane %v102_v52, %v2193_v23  ;;  %v152_v59 = vrot.slane %v102_v52, %v2196_v24  ;;  %v2258_v62 = vrot.slane %v102_v52, %v2202_v26 }
  0xaa   :  { %v138_v44 = vmul.f32 %v2179_v16, %v2205_v28  ;;  %v283_v48 = vadd.f32 %v275_v43, %v267_v42 }
  0xab   :  { %687 = vbcast.lane.b32.xlu0 %v1969_v1, 264  ;;  %773 = vbcast.lane.b32.xlu1 %v1971_v5, 272  ;;  %v141_v37 = vmul.f32 %v2151_v2, %v2252_v58  ;;  %v182_v38 = vmul.f32 %v2163_v7, %v152_v59 }
  0xac   :  { %v269_v51 = vadd.f32 %v179_v47, %v138_v44  ;;  %v316_v54 = vadd.f32 %v2216_v32, %v283_v48  ;;  %v2255_v60 = vpop.permute.xlu1 %347  ;;  %v1008_v44 = vsel %vm1001_vm1, %v999_v34, 0.0  ;;  %v140_v34 = vmul.f32 %v2146_v0, %v2252_v58 }
  0xad   :  { %v2183_v19 = vpop.permute.xlu0 %204 }
  0xae   :  { %v285_v55 = vadd.f32 %v277_v53, %v269_v51  ;;  %v143_v51 = vmul.f32 %v2156_v4, %v2252_v58  ;;  %v1000_v53 = vld [vmem:[%s3235_s2 + $0x18] sm:$0xff] }
  0xaf   :  { %695 = vbcast.lane.b32.xlu0 %v1969_v1, 280  ;;  %854 = vbcast.lane.b32.xlu1 %v1972_v8, 256  ;;  %v139_v1 = vmul.f32 %v2156_v4, %v2205_v28  ;;  %v1011_v4 = vsel %vm1001_vm1, %v1000_v53, 0.0 }
  0xb0   :  { %v318_v12 = vadd.f32 %v2231_v39, %v285_v55  ;;  %v272_v55 = vadd.f32 %v182_v38, %v141_v37 }
  0xb1   :  { %v2190_v22 = vpop.permute.xlu0 %212 }
  0xb2   :  { %v221_v63 = vmul.f32 %v2190_v22, %v2211_v30  ;;  %v326_v45 = vmax.f32 %v318_v12, 0.0 }
  0xb3   :  { %728 = vbcast.lane.b32.xlu0 %v1970_v3, 264  ;;  %862 = vbcast.lane.b32.xlu1 %v1972_v8, 272 }
  0xb5   :  { %v2218_v33 = vpop.permute.xlu0 %245 }
  0xb6   :  { %v264_v14 = vmul.f32 %v2218_v33, %v2258_v62 }
  0xb7   :  { %736 = vbcast.lane.b32.xlu0 %v1970_v3, 280  ;;  %895 = vbcast.lane.b32.xlu1 %v1973_v10, 256  ;;  %v180_v3 = vmul.f32 %v2173_v11, %v2208_v29 }
  0xb9   :  { %v254_v40 = vpop.permute.xlu0 %253 }
  0xba   :  { %v262_v56 = vmul.f32 %v254_v40, %v2214_v31  ;;  %v266_v47 = vmul.f32 %v254_v40, %v2258_v62  ;;  %v359_v40 = vmul.f32 %v2255_v60, %v326_v45 }
  0xbb   :  { %769 = vbcast.lane.b32.xlu0 %v1971_v5, 264  ;;  %903 = vbcast.lane.b32.xlu1 %v1973_v10, 272 }
  0xbc   :  { %v278_v27 = vadd.f32 %v262_v56, %v221_v63  ;;  %v184_v56 = vmul.f32 %v2173_v11, %v152_v59 }
  0xbd   :  { %v2244_v50 = vpop.permute.xlu0 %302 }
  0xbe   :  { %v274_v12 = vadd.f32 %v184_v56, %v143_v51 }
  0xbf   :  { %777 = vbcast.lane.b32.xlu0 %v1971_v5, 280  ;;  %v324_v5 = vmax.f32 %v316_v54, 0.0 }
  0xc1   :  { %v311_v61 = vpop.permute.xlu0 %310  ;;  %v357_v42 = vmul.f32 %v2242_v49, %v324_v5 }
  0xc3   :  { %858 = vbcast.lane.b32.xlu0 %v1972_v8, 264 }
  0xc5   :  { %v2284_v43 = vpop.permute.xlu0 %343 }
  0xc7   :  { %866 = vbcast.lane.b32.xlu0 %v1972_v8, 280  ;;  %v1002_v8 = vsel %vm1001_vm1, %v997_v57, 0.0 }
  0xcb   :  { %899 = vbcast.lane.b32.xlu0 %v1973_v10, 264 }
  0xcf   :  { %907 = vbcast.lane.b32.xlu0 %v1973_v10, 280  ;;  %v2268_v10 = vrot.slane %v102_v52, %v2199_v25 }
  0xd1   :  { %v223_v36 = vmul.f32 %v2183_v19, %v2268_v10  ;;  %v225_v54 = vmul.f32 %v2190_v22, %v2268_v10 }
  0xd3   :  { %v280_v46 = vadd.f32 %v264_v14, %v223_v36  ;;  %v282_v63 = vadd.f32 %v266_v47, %v225_v54  ;;  %v181_v36 = vmul.f32 %v2161_v6, %v152_v59  ;;  %v183_v6 = vmul.f32 %v2168_v9, %v152_v59 }
  0xd5   :  { %v290_v22 = vadd.f32 %v282_v63, %v274_v12 }
  0xd7   :  { %v323_v38 = vadd.f32 %v311_v61, %v290_v22 }
  0xdf   :  { %1006 = vadd.xlane.f32.xlu1 %v1005_v41  ;;  %v270_v41 = vadd.f32 %v180_v3, %v139_v1  ;;  %v288_v1 = vadd.f32 %v280_v46, %v272_v55  ;;  %v352_v3 = vpop.permute.xlu0 %351  ;;  %v137_v46 = vmul.f32 %v2151_v2, %v2205_v28 }
  0xe1   :  { %v286_v48 = vadd.f32 %v278_v27, %v270_v41  ;;  %v222_v41 = vmul.f32 %v2175_v13, %v2268_v10  ;;  %v219_v13 = vmul.f32 %v2183_v19, %v2211_v30  ;;  %v224_v19 = vmul.f32 %v2177_v15, %v2268_v10 }
  0xe3   :  { %v319_v57 = vadd.f32 %v311_v61, %v286_v48  ;;  %v142_v61 = vmul.f32 %v2179_v16, %v2252_v58  ;;  %v331_v48 = vmax.f32 %v323_v38, 0.0 }
  0xe5   :  { %v327_v14 = vmax.f32 %v319_v57, 0.0  ;;  %v364_v30 = vmul.f32 %v352_v3, %v331_v48  ;;  %v273_v15 = vadd.f32 %v183_v6, %v142_v61 }
  0xe7   :  { %v360_v11 = vmul.f32 %v352_v3, %v327_v14 }
  0xeb   :  { %v2276_v35 = vpop.xlane.xlu1 %456 }
  0xee   :  { %1003 = vadd.xlane.f32.xlu0 %v1002_v8  ;;  %v321_v8 = vadd.f32 %v2244_v50, %v288_v1 }
  0xef   :  { %v2290_v52 = vpop.permute.xlu1 %482 }
  0xf0   :  { %374 = vperm.xlu1 %1994, %v357_v42   ;;  %v329_v37 = vmax.f32 %v321_v8, 0.0  ;;  %v263_v42 = vmul.f32 %v2181_v18, %v2258_v62  ;;  %v178_v18 = vmul.f32 %v2163_v7, %v2208_v29  ;;  %v265_v7 = vmul.f32 %v2188_v21, %v2258_v62 }
  0xf2   :  { %1009 = vadd.xlane.f32.xlu0 %v1008_v44  ;;  %v260_v44 = vmul.f32 %v2218_v33, %v2214_v31  ;;  %v362_v0 = vmul.f32 %v2284_v43, %v329_v37  ;;  %v271_v33 = vadd.f32 %v181_v36, %v140_v34  ;;  %v279_v16 = vadd.f32 %v263_v42, %v222_v41 }
  0xf3   :  { %v2300_v5 = vpop.permute.xlu1 %486  ;;  %v268_v51 = vadd.f32 %v178_v18, %v137_v46  ;;  %v281_v10 = vadd.f32 %v265_v7, %v224_v19  ;;  %v2401_v7 = vsub.s32 5, %v2186_v20 }
  0xf4   :  { %380 = vperm.xlu1 %1994, %v359_v40   ;;  %v276_v28 = vadd.f32 %v260_v44, %v219_v13  ;;  %v287_v55 = vadd.f32 %v279_v16, %v271_v33 }
  0xf5   :  { %v289_v63 = vadd.f32 %v281_v10, %v273_v15  ;;  %3288 = vst [vmem:[#allocation9_spill] sm:$0xff] %v2401_v7 }
  0xf6   :  { %1012 = vadd.xlane.f32.xlu0 %v1011_v4  ;;  %v284_v56 = vadd.f32 %v276_v28, %v268_v51  ;;  %v320_v40 = vadd.f32 %v2216_v32, %v287_v55 }
  0xf7   :  { %v2303_v27 = vpop.permute.xlu1 %519 }
  0xf8   :  { %383 = vperm.xlu1 %1994, %v360_v11   ;;  %v317_v62 = vadd.f32 %v2244_v50, %v284_v56  ;;  %v328_v22 = vmax.f32 %v320_v40, 0.0  ;;  %v322_v50 = vadd.f32 %v2231_v39, %v289_v63  ;;  %v461_v40 = vmul.f32 0.00390625, %v2276_v35 }
  0xf9   :  { %v2437_v35 = vsub.s32 7, %v2186_v20 }
  0xfa   :  { %v460_v45 = vpop.xlane.xlu0 %459  ;;  %v325_v8 = vmax.f32 %v317_v62, 0.0  ;;  %v330_v44 = vmax.f32 %v322_v50, 0.0  ;;  %v2429_v50 = vsub.s32 6, %v2186_v20 }
  0xfb   :  { %v2317_v47 = vmul.f32 0.00390625, %v460_v45  ;;  %v2326_v31 = vpop.permute.xlu1 %527  ;;  %v361_v45 = vmul.f32 %v2242_v49, %v328_v22  ;;  %v2396_v49 = vsub.s32 4, %v2186_v20  ;;  %3292 = vst [vmem:[#allocation13_spill] sm:$0xff] %v2437_v35 }
  0xfc   :  { %389 = vperm.xlu1 %1994, %v362_v0   ;;  %v358_v11 = vmul.f32 %v2284_v43, %v325_v8  ;;  %v363_v13 = vmul.f32 %v2255_v60, %v330_v44  ;;  %3291 = vst [vmem:[#allocation12_spill] sm:$0xff] %v2429_v50 }
  0xfd   :  { %v2330_v2 = vrot.slane %v2317_v47, %v2193_v23  ;;  %v2334_v9 = vrot.slane %v2317_v47, %v2196_v24  ;;  %v2368_v32 = vrot.slane %v2317_v47, %v2199_v25  ;;  %v2374_v37 = vrot.slane %v2317_v47, %v2202_v26  ;;  %3287 = vst [vmem:[#allocation8_spill] sm:$0xff] %v2396_v49 }
  0xfe   :  { %v2340_v29 = vpop.permute.xlu0 %478  ;;  %v676_v51 = vrot.slane %v2317_v47, %v2401_v7 }
  0xff   :  { %v502_v58 = vmul.f32 %v2300_v5, %v2330_v2  ;;  %v543_v59 = vmul.f32 %v2326_v31, %v2334_v9  ;;  %v2346_v53 = vpop.permute.xlu1 %560  ;;  %v501_v4 = vmul.f32 %v2290_v52, %v2330_v2 }
 0x100   :  { %395 = vperm.xlu1 %1994, %v364_v30  }
 0x101   :  { %v797_v54 = vadd.f32 %v543_v59, %v502_v58  ;;  %v2407_v58 = vrot.slane %v2317_v47, %v2396_v49 }
 0x102   :  { %v2348_v21 = vpop.permute.xlu0 %490 }
 0x103   :  { %v2351_v57 = vpop.permute.xlu1 %568  ;;  %v503_v36 = vmul.f32 %v2348_v21, %v2330_v2 }
 0x104   :  { %v584_v39 = vmul.f32 %v2351_v57, %v2368_v32 }
 0x106   :  { %v2354_v1 = vpop.permute.xlu0 %523 }
 0x107   :  { %v542_v3 = vmul.f32 %v2354_v1, %v2334_v9  ;;  %v2360_v12 = vpop.permute.xlu1 %601 }
 0x109   :  { %v796_v14 = vadd.f32 %v542_v3, %v501_v4  ;;  %v2424_v3 = vrot.slane %v461_v40, %v2196_v24 }
 0x10a   :  { %v2364_v34 = vpop.permute.xlu0 %531 }
 0x10b   :  { %v544_v38 = vmul.f32 %v2364_v34, %v2334_v9  ;;  %v610_v41 = vpop.permute.xlu1 %609 }
 0x10c   :  { %377 = vperm.xlu0 %1995, %v358_v11   ;;  %v625_v42 = vmul.f32 %v610_v41, %v2374_v37 }
 0x10d   :  { %v798_v43 = vadd.f32 %v544_v38, %v503_v36  ;;  %v2440_v36 = vrot.slane %v461_v40, %v2199_v25  ;;  %v2443_v38 = vrot.slane %v461_v40, %v2202_v26 }
 0x10e   :  { %v2382_v46 = vpop.permute.xlu0 %564  ;;  %v805_v0 = vadd.f32 %v625_v42, %v584_v39  ;;  %v2446_v39 = vrot.slane %v461_v40, %v2396_v49  ;;  %v537_v42 = vmul.f32 %v2303_v27, %v2424_v3 }
 0x10f   :  { %v2384_v6 = vpop.permute.xlu1 %642  ;;  %v583_v16 = vmul.f32 %v2382_v46, %v2368_v32 }
 0x110   :  { %386 = vperm.xlu0 %1995, %v361_v45   ;;  %v2386_v61 = vadd.f32 %v805_v0, %v797_v54  ;;  %v2456_v45 = vrot.slane %v461_v40, %v2429_v50  ;;  %v664_v24 = vmul.f32 %v2384_v6, %v2407_v58 }
 0x112   :  { %v2389_v18 = vpop.permute.xlu0 %572 }
 0x113   :  { %v651_v33 = vpop.permute.xlu1 %650  ;;  %v585_v59 = vmul.f32 %v2389_v18, %v2368_v32 }
 0x114   :  { %392 = vperm.xlu0 %1995, %v363_v13   ;;  %v666_v10 = vmul.f32 %v651_v33, %v2407_v58  ;;  %v2459_v13 = vrot.slane %v461_v40, %v2437_v35 }
 0x116   :  { %v2391_v48 = vpop.permute.xlu0 %605 }
 0x117   :  { %v624_v19 = vmul.f32 %v2391_v48, %v2374_v37  ;;  %v684_v28 = vpop.permute.xlu1 %683 }
 0x119   :  { %v804_v60 = vadd.f32 %v624_v19, %v583_v16  ;;  %v539_v19 = vmul.f32 %v2326_v31, %v2424_v3  ;;  %v578_v31 = vmul.f32 %v2346_v53, %v2440_v36 }
 0x11a   :  { %v2403_v30 = vpop.permute.xlu0 %613 }
 0x11b   :  { %v626_v54 = vmul.f32 %v2403_v30, %v2374_v37  ;;  %v692_v55 = vpop.permute.xlu1 %691  ;;  %v2415_v15 = vadd.f32 %v804_v60, %v796_v14  ;;  %v2432_v14 = vrot.slane %v461_v40, %v2193_v23  ;;  %v619_v60 = vmul.f32 %v2360_v12, %v2443_v38 }
 0x11c   :  { %v707_v62 = vmul.f32 %v692_v55, %v676_v51 }
 0x11d   :  { %3289 = vst [vmem:[#allocation10_spill] sm:$0xff] %v2415_v15  ;;  %v806_v56 = vadd.f32 %v626_v54, %v585_v59  ;;  %v496_v44 = vmul.f32 %v2340_v29, %v2432_v14  ;;  %v498_v16 = vmul.f32 %v2300_v5, %v2432_v14  ;;  %v2469_v59 = vrot.slane %v2317_v47, %v2429_v50 }
 0x11e   :  { %v2419_v63 = vpop.permute.xlu0 %646  ;;  %v2421_v4 = vadd.f32 %v707_v62, %v666_v10  ;;  %v541_v54 = vmul.f32 %v2303_v27, %v2334_v9  ;;  %v500_v10 = vmul.f32 %v2340_v29, %v2330_v2  ;;  %v2478_v5 = vrot.slane %v2317_v47, %v2437_v35 }
 0x11f   :  { %v725_v8 = vpop.permute.xlu1 %724  ;;  %v2426_v22 = vadd.f32 %v806_v56, %v798_v43  ;;  %v2449_v43 = vrot.slane %v461_v40, %v2401_v7  ;;  %v621_v56 = vmul.f32 %v610_v41, %v2443_v38  ;;  %v582_v40 = vmul.f32 %v2346_v53, %v2368_v32 }
 0x120   :  { %v665_v17 = vmul.f32 %v2419_v63, %v2407_v58  ;;  %v791_v9 = vadd.f32 %v537_v42, %v496_v44  ;;  %v580_v2 = vmul.f32 %v2351_v57, %v2440_v36  ;;  %v623_v29 = vmul.f32 %v2360_v12, %v2374_v37 }
 0x121   :  { %3290 = vst [vmem:[#allocation11_spill] sm:$0xff] %v2426_v22  ;;  %v701_v47 = vmul.f32 %v684_v28, %v2449_v43  ;;  %v799_v35 = vadd.f32 %v619_v60, %v578_v31  ;;  %v742_v50 = vmul.f32 %v725_v8, %v2456_v45  ;;  %v660_v42 = vmul.f32 %v2384_v6, %v2446_v39 }
 0x122   :  { %v2434_v11 = vpop.permute.xlu0 %654  ;;  %v801_v32 = vadd.f32 %v621_v56, %v580_v2  ;;  %v662_v44 = vmul.f32 %v651_v33, %v2446_v39  ;;  %v703_v12 = vmul.f32 %v692_v55, %v2449_v43  ;;  %v746_v26 = vmul.f32 %v725_v8, %v2469_v59 }
 0x123   :  { %v733_v0 = vpop.permute.xlu1 %732  ;;  %v667_v37 = vmul.f32 %v2434_v11, %v2407_v58  ;;  %v803_v20 = vadd.f32 %v623_v29, %v582_v40  ;;  %v795_v6 = vadd.f32 %v541_v54, %v500_v10 }
 0x124   :  { %v744_v56 = vmul.f32 %v733_v0, %v2456_v45  ;;  %v748_v25 = vmul.f32 %v733_v0, %v2469_v59  ;;  %v809_v8 = vadd.f32 %v703_v12, %v662_v44 }
 0x126   :  { %v688_v62 = vpop.permute.xlu0 %687 }
 0x127   :  { %v706_v27 = vmul.f32 %v688_v62, %v676_v51  ;;  %v766_v41 = vpop.permute.xlu1 %765 }
 0x128   :  { %v783_v53 = vmul.f32 %v766_v41, %v2459_v13  ;;  %v787_v57 = vmul.f32 %v766_v41, %v2478_v5 }
 0x129   :  { %v2492_v7 = vadd.f32 %v706_v27, %v665_v17  ;;  %v705_v17 = vmul.f32 %v684_v28, %v676_v51  ;;  %v807_v27 = vadd.f32 %v701_v47, %v660_v42  ;;  %v793_v47 = vadd.f32 %v539_v19, %v498_v16 }
 0x12a   :  { %v696_v49 = vpop.permute.xlu0 %695  ;;  %v815_v60 = vadd.f32 %v783_v53, %v742_v50  ;;  %v819_v50 = vadd.f32 %v787_v57, %v746_v26  ;;  %v497_v26 = vmul.f32 %v2290_v52, %v2432_v14  ;;  %v827_v52 = vadd.f32 %v803_v20, %v795_v6 }
 0x12b   :  { %v708_v31 = vmul.f32 %v696_v49, %v676_v51  ;;  %v774_v2 = vpop.permute.xlu1 %773  ;;  %v823_v51 = vadd.f32 %v799_v35, %v791_v9  ;;  %v811_v22 = vadd.f32 %v705_v17, %v664_v24  ;;  %v704_v9 = vmul.f32 %v696_v49, %v2449_v43 }
 0x12c   :  { %v785_v41 = vmul.f32 %v774_v2, %v2459_v13  ;;  %v789_v55 = vmul.f32 %v774_v2, %v2478_v5  ;;  %v831_v28 = vadd.f32 %v815_v60, %v807_v27 }
 0x12d   :  { %v2505_v33 = vadd.f32 %v708_v31, %v667_v37  ;;  %v538_v31 = vmul.f32 %v2354_v1, %v2424_v3  ;;  %v835_v58 = vadd.f32 %v819_v50, %v811_v22  ;;  %v620_v1 = vmul.f32 %v2391_v48, %v2443_v38 }
 0x12e   :  { %v729_v53 = vpop.permute.xlu0 %728  ;;  %v817_v42 = vadd.f32 %v785_v41, %v744_v56  ;;  %v821_v23 = vadd.f32 %v789_v55, %v748_v25  ;;  %v839_v37 = vadd.f32 %v831_v28, %v823_v51  ;;  %v499_v25 = vmul.f32 %v2348_v21, %v2432_v14  ;;  %v3294_v28 = vld [vmem:[#allocation10_spill] sm:$0xff] }
 0x12f   :  { %3293 = vst [vmem:[#allocation14_spill] sm:$0xff] %v2505_v33  ;;  %v855_v0 = vpop.permute.xlu1 %854  ;;  %v825_v33 = vadd.f32 %v801_v32, %v793_v47  ;;  %v792_v22 = vadd.f32 %v538_v31, %v497_v26  ;;  %v540_v21 = vmul.f32 %v2364_v34, %v2424_v3  ;;  %v579_v14 = vmul.f32 %v2382_v46, %v2440_v36 }
 0x130   :  { %v833_v2 = vadd.f32 %v817_v42, %v809_v8  ;;  %v837_v15 = vadd.f32 %v821_v23, %v2421_v4  ;;  %v872_v16 = vadd.f32 %v855_v0, %v839_v37  ;;  %v622_v23 = vmul.f32 %v2403_v30, %v2443_v38 }
 0x131   :  { %v702_v4 = vmul.f32 %v688_v62, %v2449_v43  ;;  %v661_v48 = vmul.f32 %v2419_v63, %v2446_v39  ;;  %v743_v30 = vmul.f32 %v729_v53, %v2456_v45  ;;  %v747_v10 = vmul.f32 %v729_v53, %v2469_v59 }
 0x132   :  { %v737_v35 = vpop.permute.xlu0 %736  ;;  %v841_v24 = vadd.f32 %v833_v2, %v825_v33  ;;  %v2519_v19 = vadd.f32 %v837_v15, %v2386_v61  ;;  %v581_v61 = vmul.f32 %v2389_v18, %v2440_v36  ;;  %v843_v15 = vadd.f32 %v835_v58, %v827_v52  ;;  %v3296_v2 = vld [vmem:[#allocation11_spill] sm:$0xff]  ;;  %v2567_v58 = vld [vmem:[%s3236_s5] ss:$0 sm:$0xff] }
 0x133   :  { %v2526_v54 = vpop.permute.xlu1 %862  ;;  %v880_v62 = vmax.f32 %v872_v16, 0.0  ;;  %v800_v46 = vadd.f32 %v620_v1, %v579_v14  ;;  %v663_v18 = vmul.f32 %v2434_v11, %v2446_v39  ;;  %v808_v36 = vadd.f32 %v702_v4, %v661_v48  ;;  %v2577_v1 = vld [vmem:[%s3236_s5 + $0x1] ss:$0 sm:$0xff]  ;;  %v2601_v14 = vld [vmem:[%s3236_s5 + $0x4] ss:$0 sm:$0xff] }
 0x134   :  { %v874_v20 = vadd.f32 %v2526_v54, %v841_v24  ;;  %v802_v40 = vadd.f32 %v622_v23, %v581_v61  ;;  %v876_v57 = vadd.f32 %v855_v0, %v843_v15  ;;  %v745_v12 = vmul.f32 %v737_v35, %v2456_v45  ;;  %v2608_v61 = vld [vmem:[%s3236_s5 + $0x5] ss:$0 sm:$0xff]  ;;  %v2615_v48 = vld [vmem:[%s3236_s5 + $0x6] ss:$0 sm:$0xff]  ;;  %v2629_v15 = vld [vmem:[%s3236_s5 + $0x8] ss:$0 sm:$0xff] }
 0x135   :  { %v749_v60 = vmul.f32 %v737_v35, %v2469_v59  ;;  %v794_v41 = vadd.f32 %v540_v21, %v499_v25  ;;  %v824_v43 = vadd.f32 %v800_v46, %v792_v22  ;;  %v810_v55 = vadd.f32 %v704_v9, %v663_v18  ;;  %v2587_v22 = vld [vmem:[%s3236_s5 + $0x2] ss:$0 sm:$0xff]  ;;  %v2594_v21 = vld [vmem:[%s3236_s5 + $0x3] ss:$0 sm:$0xff]  ;;  %v2681_v9 = vld [vmem:[%s3236_s5 + $0xf] ss:$0 sm:$0xff] }
 0x136   :  { %v770_v38 = vpop.permute.xlu0 %769  ;;  %v882_v17 = vmax.f32 %v874_v20, 0.0  ;;  %v2636_v20 = vld [vmem:[%s3236_s5 + $0x9] ss:$0 sm:$0xff] }
 0x137   :  { %v784_v34 = vmul.f32 %v770_v38, %v2459_v13  ;;  %v788_v3 = vmul.f32 %v770_v38, %v2478_v5  ;;  %v896_v63 = vpop.permute.xlu1 %895  ;;  %v826_v47 = vadd.f32 %v802_v40, %v794_v41  ;;  %v2643_v38 = vld [vmem:[%s3236_s5 + $0xa] ss:$0 sm:$0xff]  ;;  %v2667_v40 = vld [vmem:[%s3236_s5 + $0xd] ss:$0 sm:$0xff] }
 0x138   :  { %v913_v44 = vmul.f32 %v896_v63, %v880_v62  ;;  %v2652_v62 = vld [vmem:[%s3236_s5 + $0xb] ss:$0 sm:$0xff] }
 0x139   :  { %v816_v29 = vadd.f32 %v784_v34, %v743_v30  ;;  %v820_v32 = vadd.f32 %v788_v3, %v747_v10  ;;  %v2622_v30 = vld [vmem:[%s3236_s5 + $0x7] ss:$0 sm:$0xff]  ;;  %v2659_v34 = vld [vmem:[%s3236_s5 + $0xc] ss:$0 sm:$0xff] }
 0x13a   :  { %v778_v27 = vpop.permute.xlu0 %777  ;;  %930 = vperm.xlu1 %1994, %v913_v44  }
 0x13b   :  { %v786_v56 = vmul.f32 %v778_v27, %v2459_v13  ;;  %v790_v33 = vmul.f32 %v778_v27, %v2478_v5  ;;  %v832_v11 = vadd.f32 %v816_v29, %v808_v36  ;;  %v836_v39 = vadd.f32 %v820_v32, %v2492_v7  ;;  %v2549_v49 = vpop.permute.xlu1 %903  ;;  %v3295_v7 = vld [vmem:[#allocation14_spill] sm:$0xff]  ;;  %v2673_v36 = vld [vmem:[%s3236_s5 + $0xe] ss:$0 sm:$0xff] }
 0x13c   :  { %v915_v45 = vmul.f32 %v2549_v49, %v882_v17  ;;  %v884_v5 = vmax.f32 %v876_v57, 0.0  ;;  %v3297_v29 = vlaneseq  ;;  %v3298_v17 = vld [vmem:[#allocation3_spill] sm:$0xff] }
 0x13d   :  { %v818_v50 = vadd.f32 %v786_v56, %v745_v12  ;;  %v822_v53 = vadd.f32 %v790_v33, %v749_v60  ;;  %v840_v59 = vadd.f32 %v832_v11, %v824_v43  ;;  %v2553_v51 = vadd.f32 %v836_v39, %v3294_v28 }
 0x13e   :  { %v2555_v13 = vpop.permute.xlu0 %858  ;;  %936 = vperm.xlu1 %1994, %v915_v45   ;;  %v917_v0 = vmul.f32 %v896_v63, %v884_v5  ;;  %v398_v32 = vand.u32 127, %v3297_v29  ;;  %v3305_v29 = vld [vmem:[#allocation5_spill] sm:$0xff] }
 0x13f   :  { %v834_v8 = vadd.f32 %v818_v50, %v810_v55  ;;  %v838_v42 = vadd.f32 %v822_v53, %v3295_v7  ;;  %v873_v37 = vadd.f32 %v2555_v13, %v840_v59 }
 0x140   :  { %v403_v57 = vadd.s32 4294967288, %v398_v32  ;;  %v410_v60 = vadd.s32 4294967280, %v398_v32  ;;  %v2688_v27 = vsub.s32 %v398_v32, %v3298_v17  ;;  %v417_v39 = vadd.s32 4294967272, %v398_v32 }
 0x141   :  { %v842_v31 = vadd.f32 %v834_v8, %v826_v47  ;;  %v2560_v26 = vadd.f32 %v838_v42, %v3296_v2  ;;  %v881_v35 = vmax.f32 %v873_v37, 0.0 }
 0x142   :  { %v2562_v6 = vpop.permute.xlu0 %866  ;;  %942 = vperm.xlu1 %1994, %v917_v0   ;;  %3299 = vst [vmem:[#allocation10_spill] sm:$0xff] %v2688_v27  ;;  %v2691_v56 = vsub.s32 %v403_v57, %v3298_v17  ;;  %v2696_v43 = vsub.s32 %v410_v60, %v3298_v17  ;;  %v2701_v53 = vsub.s32 %v417_v39, %v3298_v17 }
 0x143   :  { %v875_v25 = vadd.f32 %v2562_v6, %v842_v31 }
 0x144   :  { %3300 = vst [vmem:[#allocation14_spill] sm:$0xff] %v2691_v56  ;;  %3301 = vst [vmem:[#allocation11_spill] sm:$0xff] %v2696_v43 }
 0x145   :  { %v883_v23 = vmax.f32 %v875_v25, 0.0  ;;  %3302 = vst [vmem:[#allocation3_spill] sm:$0xff] %v2701_v53 }
 0x146   :  { %v2570_v16 = vpop.permute.xlu0 %899  ;;  %1033 = vbcast.lane.b32.xlu1 %v2567_v58, 256 }
 0x147   :  { %v914_v24 = vmul.f32 %v2570_v16, %v881_v35 }
 0x149   :  { %933 = vperm.xlu0 %1995, %v914_v24  }
 0x14a   :  { %v2579_v4 = vpop.permute.xlu0 %907  ;;  %1074 = vbcast.lane.b32.xlu1 %v2577_v1, 256 }
 0x14b   :  { %v916_v52 = vmul.f32 %v2579_v4, %v883_v23 }
 0x14d   :  { %939 = vperm.xlu0 %1995, %v916_v52  }
 0x14e   :  { %1078 = vbcast.lane.b32.xlu1 %v2577_v1, 264 }
 0x151   :  { %1037 = vbcast.lane.b32.xlu0 %v2567_v58, 264 }
 0x152   :  { %1119 = vbcast.lane.b32.xlu1 %v2587_v22, 264 }
 0x155   :  { %1115 = vbcast.lane.b32.xlu0 %v2587_v22, 256 }
 0x156   :  { %1160 = vbcast.lane.b32.xlu1 %v2594_v21, 264 }
 0x159   :  { %1156 = vbcast.lane.b32.xlu0 %v2594_v21, 256 }
 0x15a   :  { %1201 = vbcast.lane.b32.xlu1 %v2601_v14, 264 }
 0x15d   :  { %1197 = vbcast.lane.b32.xlu0 %v2601_v14, 256 }
 0x15e   :  { %1242 = vbcast.lane.b32.xlu1 %v2608_v61, 264 }
 0x161   :  { %1238 = vbcast.lane.b32.xlu0 %v2608_v61, 256 }
 0x162   :  { %1283 = vbcast.lane.b32.xlu1 %v2615_v48, 264 }
 0x165   :  { %1279 = vbcast.lane.b32.xlu0 %v2615_v48, 256 }
 0x166   :  { %1324 = vbcast.lane.b32.xlu1 %v2622_v30, 264 }
 0x169   :  { %1320 = vbcast.lane.b32.xlu0 %v2622_v30, 256 }
 0x16a   :  { %1365 = vbcast.lane.b32.xlu1 %v2629_v15, 264 }
 0x16c   :  { %v2647_v10 = vpop.xlane.xlu1 %1006 }
 0x16d   :  { %1361 = vbcast.lane.b32.xlu0 %v2629_v15, 256 }
 0x16e   :  { %1406 = vbcast.lane.b32.xlu1 %v2636_v20, 264 }
 0x170   :  { %v375_v3 = vpop.permute.xlu1 %374 }
 0x171   :  { %1402 = vbcast.lane.b32.xlu0 %v2636_v20, 256  ;;  %v402_v55 = vrot.slane %v375_v3, %v2688_v27 }
 0x172   :  { %1447 = vbcast.lane.b32.xlu1 %v2643_v38, 264 }
 0x174   :  { %v381_v18 = vpop.permute.xlu1 %380 }
 0x175   :  { %1443 = vbcast.lane.b32.xlu0 %v2643_v38, 256  ;;  %v414_v28 = vrot.slane %v381_v18, %v2696_v43 }
 0x176   :  { %1488 = vbcast.lane.b32.xlu1 %v2652_v62, 264 }
 0x178   :  { %v384_v44 = vpop.permute.xlu1 %383 }
 0x179   :  { %v421_v0 = vrot.slane %v384_v44, %v2701_v53 }
 0x17a   :  { %1529 = vbcast.lane.b32.xlu1 %v2659_v34, 264 }
 0x17b   :  { %v2662_v46 = vpop.xlane.xlu0 %1003 }
 0x17c   :  { %v390_v11 = vpop.permute.xlu1 %389 }
 0x17d   :  { %v431_v47 = vrot.slane %v390_v11, %v2691_v56 }
 0x17e   :  { %1570 = vbcast.lane.b32.xlu1 %v2667_v40, 264 }
 0x17f   :  { %v2675_v63 = vpop.xlane.xlu0 %1009 }
 0x180   :  { %v396_v5 = vpop.permute.xlu1 %395 }
 0x181   :  { %v441_v37 = vrot.slane %v396_v5, %v2701_v53 }
 0x182   :  { %1611 = vbcast.lane.b32.xlu1 %v2673_v36, 264 }
 0x183   :  { %v2684_v12 = vpop.xlane.xlu0 %1012 }
 0x186   :  { %1652 = vbcast.lane.b32.xlu1 %v2681_v9, 264 }
 0x18a   :  { %1082 = vbcast.lane.b32.xlu1 %v2577_v1, 272 }
 0x18b   :  { %v378_v33 = vpop.permute.xlu0 %377 }
 0x18c   :  { %v407_v41 = vrot.slane %v378_v33, %v2691_v56 }
 0x18e   :  { %1164 = vbcast.lane.b32.xlu1 %v2594_v21, 272  ;;  %v409_v45 = vsel %vm408_vm2, %v407_v41, %v402_v55 }
 0x18f   :  { %v387_v50 = vpop.permute.xlu0 %386  ;;  %v416_v42 = vsel %vm415_vm3, %v414_v28, %v409_v45 }
 0x190   :  { %v427_v59 = vrot.slane %v387_v50, %v2688_v27  ;;  %v423_v35 = vsel %vm422_vm4, %v421_v0, %v416_v42 }
 0x192   :  { %1246 = vbcast.lane.b32.xlu1 %v2608_v61, 272  ;;  %v432_v31 = vsel %vm408_vm2, %v431_v47, %v427_v59 }
 0x193   :  { %v393_v8 = vpop.permute.xlu0 %392 }
 0x194   :  { %v436_v7 = vrot.slane %v393_v8, %v2696_v43 }
 0x196   :  { %v437_v2 = vsel %vm415_vm3, %v436_v7, %v432_v31  ;;  %1328 = vbcast.lane.b32.xlu1 %v2622_v30, 272  ;;  %v2787_v7 = vld [vmem:[%s3232_s7 + $0x2] ss:$0 sm:$0xff] }
 0x197   :  { %v442_v25 = vsel %vm422_vm4, %v441_v37, %v437_v2  ;;  %v878_v2 = vadd.f32 %v2526_v54, %v2519_v19 }
 0x198   :  { %v444_v24 = vsel %vm443_vm5, %v442_v25, %v423_v35 }
 0x199   :  { %v447_v23 = vsel %vm446_vm6, %v444_v24, 0.0  ;;  %v886_v54 = vmax.f32 %v878_v2, 0.0  ;;  %v3309_v2 = vld [vmem:[#allocation8_spill] sm:$0xff] }
 0x19a   :  { %448 = vadd.xlane.f32.xlu0 %v447_v23  ;;  %1410 = vbcast.lane.b32.xlu1 %v2636_v20, 272 }
 0x19e   :  { %1492 = vbcast.lane.b32.xlu1 %v2652_v62, 272 }
 0x1a2   :  { %1574 = vbcast.lane.b32.xlu1 %v2667_v40, 272 }
 0x1a6   :  { %1656 = vbcast.lane.b32.xlu1 %v2681_v9, 272 }
 0x1aa   :  { %1086 = vbcast.lane.b32.xlu1 %v2577_v1, 280 }
 0x1ae   :  { %1168 = vbcast.lane.b32.xlu1 %v2594_v21, 280  ;;  %v2738_v21 = vmul.f32 0.015625, %v2662_v46  ;;  %v2757_v46 = vld [vmem:[%s3231_s6 + $0x2] ss:$0 sm:$0xff] }
 0x1b0   :  { %1484 = vbcast.lane.b32.xlu0 %v2652_v62, 256 }
 0x1b2   :  { %1250 = vbcast.lane.b32.xlu1 %v2608_v61, 280  ;;  %v2742_v61 = vmul.f32 0.015625, %v2675_v63 }
 0x1b4   :  { %1525 = vbcast.lane.b32.xlu0 %v2659_v34, 256  ;;  %v2767_v44 = vrot.slane %v2742_v61, %v3305_v29 }
 0x1b6   :  { %1332 = vbcast.lane.b32.xlu1 %v2622_v30, 280 }
 0x1b8   :  { %1566 = vbcast.lane.b32.xlu0 %v2667_v40, 256 }
 0x1b9   :  { %v931_v52 = vpop.permute.xlu1 %930 }
 0x1ba   :  { %1414 = vbcast.lane.b32.xlu1 %v2636_v20, 280  ;;  %v3304_v20 = vld [vmem:[#allocation4_spill] sm:$0xff]  ;;  %v956_v63 = vrot.slane %v931_v52, %v2688_v27  ;;  %v3307_v52 = vld [vmem:[#allocation6_spill] sm:$0xff] }
 0x1bc   :  { %1607 = vbcast.lane.b32.xlu0 %v2673_v36, 256 }
 0x1bd   :  { %v937_v3 = vpop.permute.xlu1 %936 }
 0x1be   :  { %1496 = vbcast.lane.b32.xlu1 %v2652_v62, 280  ;;  %v2747_v62 = vrot.slane %v2738_v21, %v3304_v20  ;;  %v965_v57 = vrot.slane %v937_v3, %v2696_v43  ;;  %v2799_v3 = vrot.slane %v2738_v21, %v3307_v52 }
 0x1c0   :  { %1648 = vbcast.lane.b32.xlu0 %v2681_v9, 256 }
 0x1c1   :  { %v2734_v1 = vpop.permute.xlu1 %942 }
 0x1c2   :  { %3303 = vst [vmem:[#allocation15_spill] sm:$0xff] %v2734_v1  ;;  %1578 = vbcast.lane.b32.xlu1 %v2667_v40, 280  ;;  %v2752_v40 = vrot.slane %v2738_v21, %v3305_v29 }
 0x1c4   :  { %1041 = vbcast.lane.b32.xlu0 %v2567_v58, 272 }
 0x1c5   :  { %v1034_v30 = vpop.permute.xlu1 %1033 }
 0x1c6   :  { %1660 = vbcast.lane.b32.xlu1 %v2681_v9, 280  ;;  %v2762_v9 = vrot.slane %v2742_v61, %v3304_v20  ;;  %v1051_v60 = vmul.f32 %v1034_v30, %v2747_v62 }
 0x1c8   :  { %1123 = vbcast.lane.b32.xlu0 %v2587_v22, 272  ;;  %v934_v18 = vpop.permute.xlu0 %933  ;;  %v1055_v33 = vmul.f32 %v1034_v30, %v2762_v9  ;;  %v2803_v30 = vrot.slane %v2742_v61, %v3307_v52 }
 0x1c9   :  { %v960_v32 = vrot.slane %v934_v18, %v2691_v56  ;;  %v1075_v17 = vpop.permute.xlu1 %1074  ;;  %v3308_v18 = vld [vmem:[#allocation7_spill] sm:$0xff] }
 0x1ca   :  { %v1092_v39 = vmul.f32 %v1075_v17, %v2752_v40  ;;  %v1096_v41 = vmul.f32 %v1075_v17, %v2767_v44  ;;  %1805 = vbcast.lane.b32.xlu1 %v2757_v46, 264  ;;  %v2811_v19 = vrot.slane %v2742_v61, %v3308_v18 }
 0x1cb   :  { %v961_v11 = vsel %vm408_vm2, %v960_v32, %v956_v63  ;;  %v2807_v63 = vrot.slane %v2738_v21, %v3308_v18 }
 0x1cc   :  { %1205 = vbcast.lane.b32.xlu0 %v2601_v14, 272  ;;  %v940_v55 = vpop.permute.xlu0 %939  ;;  %v966_v50 = vsel %vm415_vm3, %v965_v57, %v961_v11  ;;  %v1674_v45 = vadd.f32 %v1092_v39, %v1051_v60  ;;  %v1678_v59 = vadd.f32 %v1096_v41, %v1055_v33  ;;  %v919_v11 = vmul.f32 %v2549_v49, %v886_v54  ;;  %v3310_v54 = vld [vmem:[#allocation9_spill] sm:$0xff] }
 0x1cd   :  { %v970_v28 = vrot.slane %v940_v55, %v2701_v53  ;;  %v1079_v5 = vpop.permute.xlu1 %1078 }
 0x1ce   :  { %1813 = vbcast.lane.b32.xlu1 %v2757_v46, 280  ;;  %v1093_v42 = vmul.f32 %v1079_v5, %v2752_v40  ;;  %v1097_v0 = vmul.f32 %v1079_v5, %v2767_v44 }
 0x1cf   :  { %v2781_v47 = vsel %vm422_vm4, %v970_v28, %v966_v50 }
 0x1d0   :  { %3306 = vst [vmem:[#allocation4_spill] sm:$0xff] %v2781_v47  ;;  %1287 = vbcast.lane.b32.xlu0 %v2615_v48, 272  ;;  %v1038_v8 = vpop.permute.xlu0 %1037 }
 0x1d1   :  { %v1052_v37 = vmul.f32 %v1038_v8, %v2747_v62  ;;  %v1056_v31 = vmul.f32 %v1038_v8, %v2762_v9  ;;  %v1120_v35 = vpop.permute.xlu1 %1119 }
 0x1d2   :  { %1846 = vbcast.lane.b32.xlu1 %v2787_v7, 264  ;;  %v1134_v57 = vmul.f32 %v1120_v35, %v2799_v3  ;;  %v1138_v60 = vmul.f32 %v1120_v35, %v2803_v30  ;;  %v2830_v35 = vrot.slane %v2738_v21, %v3309_v2 }
 0x1d3   :  { %v1675_v25 = vadd.f32 %v1093_v42, %v1052_v37  ;;  %v1679_v24 = vadd.f32 %v1097_v0, %v1056_v31 }
 0x1d4   :  { %1369 = vbcast.lane.b32.xlu0 %v2629_v15, 272  ;;  %v1116_v23 = vpop.permute.xlu0 %1115 }
 0x1d5   :  { %v1161_v32 = vpop.permute.xlu1 %1160  ;;  %v1133_v39 = vmul.f32 %v1116_v23, %v2799_v3  ;;  %v1137_v41 = vmul.f32 %v1116_v23, %v2803_v30 }
 0x1d6   :  { %v1175_v17 = vmul.f32 %v1161_v32, %v2807_v63  ;;  %v1179_v33 = vmul.f32 %v1161_v32, %v2811_v19  ;;  %1854 = vbcast.lane.b32.xlu1 %v2787_v7, 280  ;;  %v2835_v32 = vrot.slane %v2738_v21, %v3310_v54 }
 0x1d8   :  { %1451 = vbcast.lane.b32.xlu0 %v2643_v38, 272  ;;  %v1157_v55 = vpop.permute.xlu0 %1156  ;;  %v1683_v50 = vadd.f32 %v1175_v17, %v1134_v57  ;;  %v1687_v28 = vadd.f32 %v1179_v33, %v1138_v60  ;;  %3311 = vst [vmem:[#allocation5_spill] sm:$0xff] %v2835_v32 }
 0x1d9   :  { %v1174_v5 = vmul.f32 %v1157_v55, %v2807_v63  ;;  %v1178_v8 = vmul.f32 %v1157_v55, %v2811_v19  ;;  %v1202_v42 = vpop.permute.xlu1 %1201 }
 0x1da   :  { %v2824_v0 = vadd.f32 %v1683_v50, %v1675_v25  ;;  %v2826_v37 = vadd.f32 %v1687_v28, %v1679_v24  ;;  %948 = vperm.xlu1 %1994, %v919_v11   ;;  %v2839_v25 = vrot.slane %v2742_v61, %v3309_v2  ;;  %v2843_v24 = vrot.slane %v2742_v61, %v3310_v54 }
 0x1db   :  { %v1682_v31 = vadd.f32 %v1174_v5, %v1133_v39  ;;  %v1686_v49 = vadd.f32 %v1178_v8, %v1137_v41  ;;  %v1216_v33 = vmul.f32 %v1202_v42, %v2830_v35 }
 0x1dc   :  { %1533 = vbcast.lane.b32.xlu0 %v2659_v34, 272  ;;  %v1198_v23 = vpop.permute.xlu0 %1197  ;;  %3312 = vst [vmem:[#allocation6_spill] sm:$0xff] %v2843_v24  ;;  %v1220_v11 = vmul.f32 %v1202_v42, %v2839_v25 }
 0x1dd   :  { %v1738_v57 = vadd.f32 %v1682_v31, %v1674_v45  ;;  %v1742_v60 = vadd.f32 %v1686_v49, %v1678_v59  ;;  %v1243_v17 = vpop.permute.xlu1 %1242  ;;  %v1215_v45 = vmul.f32 %v1198_v23, %v2830_v35  ;;  %v1219_v59 = vmul.f32 %v1198_v23, %v2839_v25 }
 0x1de   :  { %v1257_v39 = vmul.f32 %v1243_v17, %v2835_v32  ;;  %v1261_v41 = vmul.f32 %v1243_v17, %v2843_v24  ;;  %v3313_v17 = vld [vmem:[#allocation12_spill] sm:$0xff] }
 0x1df   :  { %v2857_v53 = vrot.slane %v2738_v21, %v3313_v17  ;;  %v2861_v23 = vrot.slane %v2742_v61, %v3313_v17 }
 0x1e0   :  { %1615 = vbcast.lane.b32.xlu0 %v2673_v36, 272  ;;  %v1239_v55 = vpop.permute.xlu0 %1238  ;;  %v1691_v50 = vadd.f32 %v1257_v39, %v1216_v33  ;;  %v1695_v28 = vadd.f32 %v1261_v41, %v1220_v11  ;;  %v3316_v33 = vld [vmem:[#allocation13_spill] sm:$0xff]  ;;  %v2872_v41 = vmul.f32 0.015625, %v2684_v12 }
 0x1e1   :  { %v1256_v5 = vmul.f32 %v1239_v55, %v2835_v32  ;;  %v1260_v8 = vmul.f32 %v1239_v55, %v2843_v24  ;;  %v1284_v31 = vpop.permute.xlu1 %1283  ;;  %3314 = vst [vmem:[#allocation7_spill] sm:$0xff] %v2857_v53  ;;  %3315 = vst [vmem:[#allocation8_spill] sm:$0xff] %v2861_v23  ;;  %v2865_v11 = vrot.slane %v2738_v21, %v3316_v33 }
 0x1e2   :  { %v2869_v39 = vrot.slane %v2742_v61, %v3316_v33 }
 0x1e3   :  { %v1690_v49 = vadd.f32 %v1256_v5, %v1215_v45  ;;  %v1694_v42 = vadd.f32 %v1260_v8, %v1219_v59  ;;  %v1298_v45 = vmul.f32 %v1284_v31, %v2857_v53  ;;  %v1302_v59 = vmul.f32 %v1284_v31, %v2861_v23 }
 0x1e4   :  { %1045 = vbcast.lane.b32.xlu0 %v2567_v58, 280  ;;  %v1280_v47 = vpop.permute.xlu0 %1279  ;;  %v2879_v8 = vmul.f32 0.015625, %v2647_v10 }
 0x1e5   :  { %v1325_v58 = vpop.permute.xlu1 %1324  ;;  %v1297_v21 = vmul.f32 %v1280_v47, %v2857_v53  ;;  %v1301_v61 = vmul.f32 %v1280_v47, %v2861_v23 }
 0x1e6   :  { %v1339_v55 = vmul.f32 %v1325_v58, %v2865_v11  ;;  %v1343_v5 = vmul.f32 %v1325_v58, %v2869_v39  ;;  %v2888_v58 = vrot.slane %v2872_v41, %v3304_v20  ;;  %v2892_v47 = vrot.slane %v2879_v8, %v3304_v20 }
 0x1e8   :  { %1127 = vbcast.lane.b32.xlu0 %v2587_v22, 280  ;;  %v1321_v12 = vpop.permute.xlu0 %1320  ;;  %v1699_v43 = vadd.f32 %v1339_v55, %v1298_v45  ;;  %v1703_v56 = vadd.f32 %v1343_v5, %v1302_v59  ;;  %v2898_v59 = vrot.slane %v2879_v8, %v3305_v29 }
 0x1e9   :  { %v1338_v1 = vmul.f32 %v1321_v12, %v2865_v11  ;;  %v1342_v31 = vmul.f32 %v1321_v12, %v2869_v39  ;;  %v1366_v27 = vpop.permute.xlu1 %1365 }
 0x1ea   :  { %v1747_v10 = vadd.f32 %v1699_v43, %v1691_v50  ;;  %v1751_v24 = vadd.f32 %v1703_v56, %v1695_v28  ;;  %v1384_v22 = vmul.f32 %v1366_v27, %v2888_v58  ;;  %v2903_v56 = vrot.slane %v2872_v41, %v3305_v29 }
 0x1eb   :  { %v1698_v32 = vadd.f32 %v1338_v1, %v1297_v21  ;;  %v1702_v53 = vadd.f32 %v1342_v31, %v1301_v61  ;;  %v1380_v1 = vmul.f32 %v1366_v27, %v2892_v47  ;;  %v2936_v31 = vrot.slane %v2879_v8, %v3307_v52 }
 0x1ec   :  { %1209 = vbcast.lane.b32.xlu0 %v2601_v14, 280  ;;  %v1362_v45 = vpop.permute.xlu0 %1361  ;;  %v2907_v50 = vadd.f32 %v1747_v10, %v2824_v0  ;;  %v2910_v14 = vadd.f32 %v1751_v24, %v2826_v37  ;;  %v2922_v0 = vrot.slane %v2872_v41, %v3307_v52 }
 0x1ed   :  { %v1746_v55 = vadd.f32 %v1698_v32, %v1690_v49  ;;  %v1750_v5 = vadd.f32 %v1702_v53, %v1694_v42  ;;  %v1383_v43 = vmul.f32 %v1362_v45, %v2888_v58  ;;  %v1407_v20 = vpop.permute.xlu1 %1406  ;;  %v1379_v29 = vmul.f32 %v1362_v45, %v2892_v47 }
 0x1ee   :  { %v1421_v28 = vmul.f32 %v1407_v20, %v2898_v59  ;;  %v1425_v32 = vmul.f32 %v1407_v20, %v2903_v56  ;;  %v2948_v45 = vrot.slane %v2872_v41, %v3308_v18  ;;  %v2956_v20 = vrot.slane %v2872_v41, %v3309_v2 }
 0x1ef   :  { %v2914_v53 = vadd.f32 %v1746_v55, %v1738_v57  ;;  %v2916_v49 = vadd.f32 %v1750_v5, %v1742_v60 }
 0x1f0   :  { %1291 = vbcast.lane.b32.xlu0 %v2615_v48, 280  ;;  %v1403_v27 = vpop.permute.xlu0 %1402  ;;  %v1707_v42 = vadd.f32 %v1421_v28, %v1380_v1  ;;  %v1711_v37 = vadd.f32 %v1425_v32, %v1384_v22  ;;  %v2944_v22 = vrot.slane %v2879_v8, %v3308_v18 }
 0x1f1   :  { %v1420_v24 = vmul.f32 %v1403_v27, %v2898_v59  ;;  %v1424_v21 = vmul.f32 %v1403_v27, %v2903_v56  ;;  %v1448_v61 = vpop.permute.xlu1 %1447  ;;  %v2962_v27 = vrot.slane %v2879_v8, %v3309_v2 }
 0x1f2   :  { %v1466_v12 = vmul.f32 %v1448_v61, %v2922_v0 }
 0x1f3   :  { %v2926_v57 = vadd.f32 %v1420_v24, %v1379_v29  ;;  %v2928_v60 = vadd.f32 %v1424_v21, %v1383_v43  ;;  %v2970_v24 = vrot.slane %v2872_v41, %v3310_v54 }
 0x1f4   :  { %1373 = vbcast.lane.b32.xlu0 %v2629_v15, 280  ;;  %v2932_v48 = vpop.permute.xlu0 %1443  ;;  %v1462_v15 = vmul.f32 %v1448_v61, %v2936_v31 }
 0x1f5   :  { %v2940_v10 = vmul.f32 %v2932_v48, %v2922_v0  ;;  %v1489_v55 = vpop.permute.xlu1 %1488  ;;  %3317 = vst [vmem:[#allocation9_spill] sm:$0xff] %v2970_v24 }
 0x1f6   :  { %v1503_v5 = vmul.f32 %v1489_v55, %v2944_v22  ;;  %v1507_v52 = vmul.f32 %v1489_v55, %v2948_v45 }
 0x1f8   :  { %1455 = vbcast.lane.b32.xlu0 %v2643_v38, 280  ;;  %v1715_v43 = vadd.f32 %v1503_v5, %v1462_v15  ;;  %v1719_v1 = vadd.f32 %v1507_v52, %v1466_v12  ;;  %v2966_v38 = vrot.slane %v2879_v8, %v3310_v54  ;;  %v2978_v12 = vrot.slane %v2872_v41, %v3313_v17 }
 0x1f9   :  { %v1530_v28 = vpop.permute.xlu1 %1529  ;;  %v2984_v54 = vrot.slane %v2879_v8, %v3313_v17  ;;  %v2988_v5 = vrot.slane %v2879_v8, %v3316_v33 }
 0x1fa   :  { %v1755_v32 = vadd.f32 %v1715_v43, %v1707_v42  ;;  %v1759_v29 = vadd.f32 %v1719_v1, %v1711_v37  ;;  %v1548_v18 = vmul.f32 %v1530_v28, %v2956_v20  ;;  %v1544_v42 = vmul.f32 %v1530_v28, %v2962_v27 }
 0x1fc   :  { %1537 = vbcast.lane.b32.xlu0 %v2659_v34, 280 }
 0x1fd   :  { %v1571_v21 = vpop.permute.xlu1 %1570 }
 0x1fe   :  { %v1585_v37 = vmul.f32 %v1571_v21, %v2966_v38  ;;  %v1589_v61 = vmul.f32 %v1571_v21, %v2970_v24 }
 0x200   :  { %1619 = vbcast.lane.b32.xlu0 %v2673_v36, 280  ;;  %v1723_v34 = vadd.f32 %v1585_v37, %v1544_v42  ;;  %v1727_v2 = vadd.f32 %v1589_v61, %v1548_v18  ;;  %v2992_v36 = vrot.slane %v2872_v41, %v3316_v33  ;;  %v877_v37 = vadd.f32 %v2555_v13, %v2553_v51 }
 0x201   :  { %v1612_v55 = vpop.permute.xlu1 %1611 }
 0x202   :  { %v1630_v15 = vmul.f32 %v1612_v55, %v2978_v12  ;;  %3318 = vst [vmem:[#allocation12_spill] sm:$0xff] %v2992_v36  ;;  %v1626_v43 = vmul.f32 %v1612_v55, %v2984_v54 }
 0x204   :  { %1801 = vbcast.lane.b32.xlu0 %v2757_v46, 256 }
 0x205   :  { %v1653_v52 = vpop.permute.xlu1 %1652 }
 0x206   :  { %v1667_v1 = vmul.f32 %v1653_v52, %v2988_v5  ;;  %v1671_v28 = vmul.f32 %v1653_v52, %v2992_v36 }
 0x208   :  { %1809 = vbcast.lane.b32.xlu0 %v2757_v46, 272  ;;  %v1731_v18 = vadd.f32 %v1667_v1, %v1626_v43  ;;  %v1735_v17 = vadd.f32 %v1671_v28, %v1630_v15  ;;  %v885_v15 = vmax.f32 %v877_v37, 0.0 }
 0x209   :  { %v2998_v21 = vpop.permute.xlu1 %1082 }
 0x20a   :  { %v1763_v42 = vadd.f32 %v1731_v18, %v1723_v34  ;;  %v1767_v8 = vadd.f32 %v1735_v17, %v1727_v2  ;;  %v879_v34 = vadd.f32 %v2562_v6, %v2560_v26  ;;  %v918_v51 = vmul.f32 %v2570_v16, %v885_v15 }
 0x20b   :  { %v1461_v18 = vmul.f32 %v2932_v48, %v2936_v31 }
 0x20c   :  { %1842 = vbcast.lane.b32.xlu0 %v2787_v7, 256  ;;  %v1779_v33 = vadd.f32 %v1763_v42, %v1755_v32  ;;  %v1783_v41 = vadd.f32 %v1767_v8, %v1759_v29  ;;  %v887_v32 = vmax.f32 %v879_v34, 0.0 }
 0x20d   :  { %v3003_v61 = vpop.permute.xlu1 %1164 }
 0x20e   :  { %v3006_v55 = vadd.f32 %v1779_v33, %v2907_v50  ;;  %v3009_v46 = vadd.f32 %v1783_v41, %v2910_v14  ;;  %v920_v29 = vmul.f32 %v2579_v4, %v887_v32 }
 0x210   :  { %1850 = vbcast.lane.b32.xlu0 %v2787_v7, 272 }
 0x211   :  { %v3015_v13 = vpop.permute.xlu1 %1246 }
 0x214   :  { %945 = vperm.xlu0 %1995, %v918_v51  }
 0x215   :  { %v3018_v2 = vpop.permute.xlu1 %1328 }
 0x218   :  { %951 = vperm.xlu0 %1995, %v920_v29  }
 0x219   :  { %v3020_v50 = vpop.permute.xlu1 %1410 }
 0x21a   :  { %v3024_v14 = vmul.f32 %v3020_v50, %v2903_v56 }
 0x21d   :  { %v3026_v26 = vpop.permute.xlu1 %1492 }
 0x21e   :  { %v3030_v6 = vmul.f32 %v3026_v26, %v2948_v45 }
 0x221   :  { %v3032_v16 = vpop.permute.xlu1 %1574 }
 0x222   :  { %v3036_v4 = vmul.f32 %v3032_v16, %v2970_v24 }
 0x225   :  { %v3038_v7 = vpop.permute.xlu1 %1656 }
 0x226   :  { %v3042_v52 = vmul.f32 %v3038_v7, %v2992_v36 }
 0x227   :  { %v3044_v43 = vpop.xlane.xlu0 %448 }
 0x228   :  { %3319 = vst [vmem:[#allocation13_spill] sm:$0xff] %v3044_v43 }
 0x229   :  { %v3046_v1 = vpop.permute.xlu1 %1086 }
 0x22b   :  { %v1485_v28 = vpop.permute.xlu0 %1484 }
 0x22c   :  { %v1502_v17 = vmul.f32 %v1485_v28, %v2944_v22  ;;  %v1506_v42 = vmul.f32 %v1485_v28, %v2948_v45 }
 0x22d   :  { %v3053_v33 = vpop.permute.xlu1 %1168 }
 0x22e   :  { %v1714_v8 = vadd.f32 %v1502_v17, %v1461_v18  ;;  %v1718_v37 = vadd.f32 %v1506_v42, %v2940_v10  ;;  %3320 = vst [vmem:[#allocation16_spill] sm:$0xff] %v3053_v33 }
 0x22f   :  { %v1526_v41 = vpop.permute.xlu0 %1525 }
 0x230   :  { %v1754_v15 = vadd.f32 %v1714_v8, %v2926_v57  ;;  %v1758_v34 = vadd.f32 %v1718_v37, %v2928_v60  ;;  %v1547_v51 = vmul.f32 %v1526_v41, %v2956_v20  ;;  %v1543_v48 = vmul.f32 %v1526_v41, %v2962_v27 }
 0x231   :  { %v3058_v32 = vpop.permute.xlu1 %1250 }
 0x232   :  { %3321 = vst [vmem:[#allocation17_spill] sm:$0xff] %v3058_v32 }
 0x233   :  { %v1567_v29 = vpop.permute.xlu0 %1566 }
 0x234   :  { %v1584_v43 = vmul.f32 %v1567_v29, %v2966_v38  ;;  %v1588_v28 = vmul.f32 %v1567_v29, %v2970_v24 }
 0x235   :  { %v3063_v17 = vpop.permute.xlu1 %1332 }
 0x236   :  { %v1722_v18 = vadd.f32 %v1584_v43, %v1543_v48  ;;  %v1726_v10 = vadd.f32 %v1588_v28, %v1547_v51  ;;  %3322 = vst [vmem:[#allocation18_spill] sm:$0xff] %v3063_v17 }
 0x237   :  { %v1608_v42 = vpop.permute.xlu0 %1607 }
 0x238   :  { %v1629_v57 = vmul.f32 %v1608_v42, %v2978_v12  ;;  %v1625_v41 = vmul.f32 %v1608_v42, %v2984_v54 }
 0x239   :  { %v3066_v8 = vpop.permute.xlu1 %1414 }
 0x23a   :  { %3323 = vst [vmem:[#allocation19_spill] sm:$0xff] %v3066_v8  ;;  %v3070_v60 = vmul.f32 %v3066_v8, %v2903_v56  ;;  %v1094_v56 = vmul.f32 %v2998_v21, %v2752_v40 }
 0x23b   :  { %v1649_v37 = vpop.permute.xlu0 %1648 }
 0x23c   :  { %3324 = vst [vmem:[#allocation20_spill] sm:$0xff] %v3070_v60  ;;  %v1666_v32 = vmul.f32 %v1649_v37, %v2988_v5  ;;  %v1670_v29 = vmul.f32 %v1649_v37, %v2992_v36 }
 0x23d   :  { %v3075_v48 = vpop.permute.xlu1 %1496 }
 0x23e   :  { %v1730_v43 = vadd.f32 %v1666_v32, %v1625_v41  ;;  %v1734_v51 = vadd.f32 %v1670_v29, %v1629_v57  ;;  %3325 = vst [vmem:[#allocation21_spill] sm:$0xff] %v3075_v48  ;;  %v3079_v28 = vmul.f32 %v3075_v48, %v2948_v45  ;;  %v1098_v41 = vmul.f32 %v2998_v21, %v2767_v44 }
 0x23f   :  { %v1042_v24 = vpop.permute.xlu0 %1041  ;;  %v1176_v45 = vmul.f32 %v3003_v61, %v2807_v63  ;;  %v1180_v29 = vmul.f32 %v3003_v61, %v2811_v19 }
 0x240   :  { %3326 = vst [vmem:[#allocation22_spill] sm:$0xff] %v3079_v28  ;;  %v1762_v8 = vadd.f32 %v1730_v43, %v1722_v18  ;;  %v1766_v60 = vadd.f32 %v1734_v51, %v1726_v10  ;;  %v1053_v42 = vmul.f32 %v1042_v24, %v2747_v62  ;;  %v1057_v17 = vmul.f32 %v1042_v24, %v2762_v9 }
 0x241   :  { %v3085_v37 = vpop.permute.xlu1 %1578 }
 0x242   :  { %v1676_v33 = vadd.f32 %v1094_v56, %v1053_v42  ;;  %3327 = vst [vmem:[#allocation23_spill] sm:$0xff] %v3085_v37  ;;  %v1778_v32 = vadd.f32 %v1762_v8, %v1754_v15  ;;  %v1782_v57 = vadd.f32 %v1766_v60, %v1758_v34  ;;  %v1680_v34 = vadd.f32 %v1098_v41, %v1057_v17 }
 0x243   :  { %v1124_v18 = vpop.permute.xlu0 %1123  ;;  %v1340_v17 = vmul.f32 %v3018_v2, %v2865_v11  ;;  %v1344_v41 = vmul.f32 %v3018_v2, %v2869_v39 }
 0x244   :  { %v1135_v10 = vmul.f32 %v1124_v18, %v2799_v3  ;;  %v1139_v43 = vmul.f32 %v1124_v18, %v2803_v30  ;;  %v3096_v24 = vadd.f32 %v1778_v32, %v2914_v53  ;;  %v3099_v15 = vadd.f32 %v1782_v57, %v2916_v49  ;;  %v3331_v18 = vld [vmem:[#allocation5_spill] sm:$0xff]  ;;  %v3332_v32 = vld [vmem:[#allocation6_spill] sm:$0xff] }
 0x245   :  { %v3101_v60 = vpop.permute.xlu1 %1660  ;;  %v1258_v53 = vmul.f32 %v3015_v13, %v3331_v18  ;;  %v1262_v49 = vmul.f32 %v3015_v13, %v3332_v32 }
 0x246   :  { %3328 = vst [vmem:[#allocation24_spill] sm:$0xff] %v3096_v24  ;;  %3329 = vst [vmem:[#allocation25_spill] sm:$0xff] %v3099_v15  ;;  %v1684_v8 = vadd.f32 %v1176_v45, %v1135_v10  ;;  %v1688_v21 = vadd.f32 %v1180_v29, %v1139_v43 }
 0x247   :  { %3330 = vst [vmem:[#allocation26_spill] sm:$0xff] %v3101_v60  ;;  %v1206_v51 = vpop.permute.xlu0 %1205 }
 0x248   :  { %v1740_v56 = vadd.f32 %v1684_v8, %v1676_v33  ;;  %v1744_v42 = vadd.f32 %v1688_v21, %v1680_v34  ;;  %v1217_v61 = vmul.f32 %v1206_v51, %v2830_v35  ;;  %v1221_v36 = vmul.f32 %v1206_v51, %v2839_v25  ;;  %v3333_v33 = vld [vmem:[#allocation7_spill] sm:$0xff] }
 0x249   :  { %v1806_v37 = vpop.permute.xlu1 %1805 }
 0x24a   :  { %v1820_v10 = vadd.f32 %v1806_v37, %v3006_v55  ;;  %v1692_v43 = vadd.f32 %v1258_v53, %v1217_v61  ;;  %v1696_v34 = vadd.f32 %v1262_v49, %v1221_v36  ;;  %v1824_v28 = vadd.f32 %v1806_v37, %v3009_v46 }
 0x24b   :  { %v1288_v57 = vpop.permute.xlu0 %1287  ;;  %v1422_v49 = vmul.f32 %v3020_v50, %v2898_v59 }
 0x24c   :  { %v1299_v45 = vmul.f32 %v1288_v57, %v3333_v33  ;;  %v1303_v29 = vmul.f32 %v1288_v57, %v2861_v23  ;;  %v1828_v2 = vmax.f32 %v1820_v10, 0.0  ;;  %v1832_v37 = vmax.f32 %v1824_v28, 0.0 }
 0x24d   :  { %v3116_v51 = vpop.permute.xlu1 %1813  ;;  %v1586_v28 = vmul.f32 %v3032_v16, %v2966_v38 }
 0x24e   :  { %v1700_v8 = vadd.f32 %v1340_v17, %v1299_v45  ;;  %v1704_v21 = vadd.f32 %v1344_v41, %v1303_v29  ;;  %v1504_v17 = vmul.f32 %v3026_v26, %v2944_v22 }
 0x24f   :  { %v1370_v13 = vpop.permute.xlu0 %1369 }
 0x250   :  { %v1748_v15 = vadd.f32 %v1700_v8, %v1692_v43  ;;  %v1752_v24 = vadd.f32 %v1704_v21, %v1696_v34  ;;  %v1385_v60 = vmul.f32 %v1370_v13, %v2888_v58  ;;  %v1381_v48 = vmul.f32 %v1370_v13, %v2892_v47 }
 0x251   :  { %v1847_v23 = vpop.permute.xlu1 %1846 }
 0x252   :  { %v1712_v57 = vadd.f32 %v3024_v14, %v1385_v60  ;;  %v1772_v55 = vadd.f32 %v1748_v15, %v1740_v56  ;;  %v1776_v61 = vadd.f32 %v1752_v24, %v1744_v42  ;;  %v1861_v36 = vmul.f32 %v1847_v23, %v1828_v2 }
 0x253   :  { %v1452_v53 = vpop.permute.xlu0 %1451  ;;  %v1708_v45 = vadd.f32 %v1422_v49, %v1381_v48  ;;  %v1865_v15 = vmul.f32 %v1847_v23, %v1832_v37  ;;  %v1668_v48 = vmul.f32 %v3038_v7, %v2988_v5  ;;  %v1095_v7 = vmul.f32 %v3046_v1, %v2752_v40  ;;  %v3334_v49 = vld [vmem:[#allocation16_spill] sm:$0xff] }
 0x254   :  { %v1463_v41 = vmul.f32 %v1452_v53, %v2936_v31  ;;  %v1467_v46 = vmul.f32 %v1452_v53, %v2922_v0  ;;  %1880 = vperm.xlu0 %1995, %v1861_v36   ;;  %v1099_v53 = vmul.f32 %v3046_v1, %v2767_v44 }
 0x256   :  { %v1716_v29 = vadd.f32 %v1504_v17, %v1463_v41  ;;  %v1720_v14 = vadd.f32 %v3030_v6, %v1467_v46  ;;  %v1177_v17 = vmul.f32 %v3334_v49, %v2807_v63 }
 0x257   :  { %v1534_v24 = vpop.permute.xlu0 %1533 }
 0x258   :  { %v1756_v60 = vadd.f32 %v1716_v29, %v1708_v45  ;;  %v1760_v56 = vadd.f32 %v1720_v14, %v1712_v57  ;;  %v1549_v42 = vmul.f32 %v1534_v24, %v2956_v20  ;;  %1892 = vperm.xlu0 %1995, %v1865_v15   ;;  %v1545_v50 = vmul.f32 %v1534_v24, %v2962_v27  ;;  %v3335_v24 = vld [vmem:[#allocation17_spill] sm:$0xff] }
 0x25a   :  { %v1728_v26 = vadd.f32 %v3036_v4, %v1549_v42  ;;  %v1724_v43 = vadd.f32 %v1586_v28, %v1545_v50  ;;  %v3337_v50 = vld [vmem:[#allocation8_spill] sm:$0xff] }
 0x25b   :  { %v1616_v10 = vpop.permute.xlu0 %1615 }
 0x25c   :  { %v1627_v6 = vmul.f32 %v1616_v10, %v2984_v54  ;;  %v1631_v23 = vmul.f32 %v1616_v10, %v2978_v12 }
 0x25e   :  { %v1732_v34 = vadd.f32 %v1668_v48, %v1627_v6  ;;  %v1736_v8 = vadd.f32 %v3042_v52, %v1631_v23  ;;  %v1181_v52 = vmul.f32 %v3334_v49, %v2811_v19 }
 0x25f   :  { %v1046_v21 = vpop.permute.xlu0 %1045 }
 0x260   :  { %v1764_v13 = vadd.f32 %v1732_v34, %v1724_v43  ;;  %v1768_v2 = vadd.f32 %v1736_v8, %v1728_v26  ;;  %v1054_v4 = vmul.f32 %v1046_v21, %v2747_v62  ;;  %v1058_v57 = vmul.f32 %v1046_v21, %v2762_v9  ;;  %v3338_v34 = vld [vmem:[#allocation20_spill] sm:$0xff] }
 0x262   :  { %v1780_v36 = vadd.f32 %v1764_v13, %v1756_v60  ;;  %v1784_v16 = vadd.f32 %v1768_v2, %v1760_v56  ;;  %v1677_v45 = vadd.f32 %v1095_v7, %v1054_v4  ;;  %v1681_v40 = vadd.f32 %v1099_v53, %v1058_v57  ;;  %v3340_v13 = vld [vmem:[#allocation21_spill] sm:$0xff] }
 0x263   :  { %v1128_v41 = vpop.permute.xlu0 %1127  ;;  %v1505_v2 = vmul.f32 %v3340_v13, %v2944_v22 }
 0x264   :  { %v1136_v46 = vmul.f32 %v1128_v41, %v2799_v3  ;;  %v1140_v62 = vmul.f32 %v1128_v41, %v2803_v30  ;;  %v3151_v9 = vadd.f32 %v1780_v36, %v1772_v55  ;;  %v3153_v37 = vadd.f32 %v1784_v16, %v1776_v61  ;;  %v3336_v61 = vld [vmem:[#allocation18_spill] sm:$0xff] }
 0x265   :  { %v1259_v3 = vmul.f32 %v3335_v24, %v3331_v18  ;;  %v1263_v30 = vmul.f32 %v3335_v24, %v3332_v32  ;;  %v1341_v60 = vmul.f32 %v3336_v61, %v2865_v11  ;;  %v1345_v56 = vmul.f32 %v3336_v61, %v2869_v39 }
 0x266   :  { %v1685_v29 = vadd.f32 %v1177_v17, %v1136_v46  ;;  %v1689_v14 = vadd.f32 %v1181_v52, %v1140_v62  ;;  %v3343_v46 = vld [vmem:[#allocation9_spill] sm:$0xff] }
 0x267   :  { %v1210_v44 = vpop.permute.xlu0 %1209 }
 0x268   :  { %v1741_v1 = vadd.f32 %v1685_v29, %v1677_v45  ;;  %v1745_v15 = vadd.f32 %v1689_v14, %v1681_v40  ;;  %v1218_v63 = vmul.f32 %v1210_v44, %v2830_v35  ;;  %v1222_v19 = vmul.f32 %v1210_v44, %v2839_v25  ;;  %v3345_v45 = vld [vmem:[#allocation12_spill] sm:$0xff] }
 0x26a   :  { %v1693_v35 = vadd.f32 %v1259_v3, %v1218_v63  ;;  %v1697_v10 = vadd.f32 %v1263_v30, %v1222_v19  ;;  %v3346_v3 = vld [vmem:[#allocation24_spill] sm:$0xff] }
 0x26b   :  { %v1292_v55 = vpop.permute.xlu0 %1291 }
 0x26c   :  { %v1300_v42 = vmul.f32 %v1292_v55, %v3333_v33  ;;  %v1304_v26 = vmul.f32 %v1292_v55, %v3337_v50  ;;  %v3339_v33 = vld [vmem:[#allocation19_spill] sm:$0xff] }
 0x26d   :  { %v1423_v21 = vmul.f32 %v3339_v33, %v2898_v59  ;;  %v3342_v59 = vld [vmem:[#allocation23_spill] sm:$0xff] }
 0x26e   :  { %v1701_v25 = vadd.f32 %v1341_v60, %v1300_v42  ;;  %v1705_v28 = vadd.f32 %v1345_v56, %v1304_v26  ;;  %v1587_v41 = vmul.f32 %v3342_v59, %v2966_v38  ;;  %v1591_v22 = vmul.f32 %v3342_v59, %v3343_v46  ;;  %v3347_v60 = vld [vmem:[#allocation25_spill] sm:$0xff] }
 0x26f   :  { %v1374_v48 = vpop.permute.xlu0 %1373  ;;  %v14_v59 = vstv %s3237_s8 }
 0x270   :  { %v1749_v18 = vadd.f32 %v1701_v25, %v1693_v35  ;;  %v1753_v6 = vadd.f32 %v1705_v28, %v1697_v10  ;;  %v1386_v32 = vmul.f32 %v1374_v48, %v2888_v58  ;;  %v1382_v11 = vmul.f32 %v1374_v48, %v2892_v47  ;;  %v3341_v58 = vld [vmem:[#allocation22_spill] sm:$0xff]  ;;  %15 = vst [vmem:[#allocation2] sm:$0x1] %v14_v59 }
 0x272   :  { %v1773_v23 = vadd.f32 %v1749_v18, %v1741_v1  ;;  %v1777_v43 = vadd.f32 %v1753_v6, %v1745_v15  ;;  %v1713_v8 = vadd.f32 %v3338_v34, %v1386_v32  ;;  %v1709_v36 = vadd.f32 %v1423_v21, %v1382_v11  ;;  %v3350_v21 = vld [vmem:[#allocation14_spill] sm:$0xff] }
 0x273   :  { %v1456_v39 = vpop.permute.xlu0 %1455 }
 0x274   :  { %v1464_v4 = vmul.f32 %v1456_v39, %v2936_v31  ;;  %v1468_v57 = vmul.f32 %v1456_v39, %v2922_v0  ;;  %v3344_v0 = vld [vmem:[#allocation26_spill] sm:$0xff]  ;;  %v3349_v39 = vld [vmem:[#allocation15_spill] sm:$0xff] }
 0x275   :  { %v1669_v62 = vmul.f32 %v3344_v0, %v2988_v5  ;;  %v1673_v40 = vmul.f32 %v3344_v0, %v3345_v45 }
 0x276   :  { %v1717_v16 = vadd.f32 %v1505_v2, %v1464_v4  ;;  %v1721_v7 = vadd.f32 %v3341_v58, %v1468_v57  ;;  %v3351_v57 = vld [vmem:[#allocation11_spill] sm:$0xff] }
 0x277   :  { %v1538_v53 = vpop.permute.xlu0 %1537  ;;  %v3352_v58 = vld [vmem:[#allocation3_spill] sm:$0xff] }
 0x278   :  { %v1757_v49 = vadd.f32 %v1717_v16, %v1709_v36  ;;  %v1761_v47 = vadd.f32 %v1721_v7, %v1713_v8  ;;  %v1546_v17 = vmul.f32 %v1538_v53, %v2962_v27  ;;  %v1550_v52 = vmul.f32 %v1538_v53, %v2956_v20 }
 0x27a   :  { %v1725_v27 = vadd.f32 %v1587_v41, %v1546_v17  ;;  %v1729_v44 = vadd.f32 %v1591_v22, %v1550_v52 }
 0x27b   :  { %v1620_v31 = vpop.permute.xlu0 %1619 }
 0x27c   :  { %v1628_v29 = vmul.f32 %v1620_v31, %v2984_v54  ;;  %v1632_v14 = vmul.f32 %v1620_v31, %v2978_v12 }
 0x27e   :  { %v1733_v20 = vadd.f32 %v1669_v62, %v1628_v29  ;;  %v1737_v1 = vadd.f32 %v1673_v40, %v1632_v14 }
 0x27f   :  { %v1802_v15 = vpop.permute.xlu0 %1801 }
 0x280   :  { %v1765_v38 = vadd.f32 %v1733_v20, %v1725_v27  ;;  %v1769_v63 = vadd.f32 %v1737_v1, %v1729_v44  ;;  %v1819_v30 = vadd.f32 %v1802_v15, %v3346_v3  ;;  %v1823_v56 = vadd.f32 %v1802_v15, %v3347_v60 }
 0x282   :  { %v1781_v19 = vadd.f32 %v1765_v38, %v1757_v49  ;;  %v1785_v24 = vadd.f32 %v1769_v63, %v1761_v47  ;;  %v1827_v42 = vmax.f32 %v1819_v30, 0.0  ;;  %v1831_v10 = vmax.f32 %v1823_v56, 0.0  ;;  %v3353_v47 = vld [vmem:[#allocation4_spill] sm:$0xff]  ;;  %v3354_v56 = vld [vmem:[#allocation13_spill] sm:$0xff] }
 0x283   :  { %v1810_v55 = vpop.permute.xlu0 %1809 }
 0x284   :  { %v1789_v5 = vadd.f32 %v1781_v19, %v1773_v23  ;;  %v1793_v61 = vadd.f32 %v1785_v24, %v1777_v43  ;;  %v1825_v54 = vadd.f32 %v1810_v55, %v3153_v37  ;;  %v1821_v25 = vadd.f32 %v1810_v55, %v3151_v9  ;;  %v1855_v23 = vpop.permute.xlu1 %1854 }
 0x286   :  { %v1822_v12 = vadd.f32 %v3116_v51, %v1789_v5  ;;  %v1826_v35 = vadd.f32 %v3116_v51, %v1793_v61  ;;  %v1833_v28 = vmax.f32 %v1825_v54, 0.0  ;;  %v1829_v43 = vmax.f32 %v1821_v25, 0.0  ;;  %v3348_v51 = vld [vmem:[#allocation10_spill] sm:$0xff] }
 0x287   :  { %v1843_v50 = vpop.permute.xlu0 %1842  ;;  %v975_v33 = vrot.slane %v3349_v39, %v3348_v51  ;;  %v1992_v54 = vld [vmem:[#allocation2] ss:$0 sm:$0xff] }
 0x288   :  { %v1860_v26 = vmul.f32 %v1843_v50, %v1827_v42  ;;  %v1864_v18 = vmul.f32 %v1843_v50, %v1831_v10  ;;  %v1834_v32 = vmax.f32 %v1826_v35, 0.0  ;;  %v1830_v34 = vmax.f32 %v1822_v12, 0.0  ;;  %v949_v9 = vpop.permute.xlu1 %948 }
 0x289   :  { %v984_v36 = vrot.slane %v949_v9, %v3351_v57 }
 0x28a   :  { %1877 = vperm.xlu1 %1994, %v1860_v26   ;;  %v1867_v11 = vmul.f32 %v1855_v23, %v1834_v32  ;;  %v1863_v2 = vmul.f32 %v1855_v23, %v1830_v34 }
 0x28b   :  { %v1851_v48 = vpop.permute.xlu0 %1850 }
 0x28c   :  { %v1866_v6 = vmul.f32 %v1851_v48, %v1833_v28  ;;  %v1862_v37 = vmul.f32 %v1851_v48, %v1829_v43 }
 0x28e   :  { %1889 = vperm.xlu1 %1994, %v1864_v18   ;;  %1895 = vperm.xlu0 %1995, %v1866_v6  }
 0x292   :  { %1898 = vperm.xlu0 %1995, %v1867_v11   ;;  %1883 = vperm.xlu1 %1994, %v1862_v37  }
 0x293   :  { %v946_v8 = vpop.permute.xlu0 %945 }
 0x294   :  { %v979_v13 = vrot.slane %v946_v8, %v3350_v21 }
 0x296   :  { %v980_v4 = vsel %vm408_vm2, %v979_v13, %v975_v33  ;;  %1886 = vperm.xlu1 %1994, %v1863_v2  }
 0x297   :  { %v952_v16 = vpop.permute.xlu0 %951  ;;  %v985_v53 = vsel %vm415_vm3, %v984_v36, %v980_v4 }
 0x298   :  { %v989_v7 = vrot.slane %v952_v16, %v3352_v58 }
 0x29a   :  { %v990_v49 = vsel %vm422_vm4, %v989_v7, %v985_v53 }
 0x29b   :  { %v991_v17 = vsel %vm443_vm5, %v990_v49, %v3353_v47 }
 0x29c   :  { %v993_v52 = vsel %vm446_vm6, %v991_v17, 0.0 }
 0x2ba   :  { %994 = vadd.xlane.f32.xlu1 %v993_v52 }
 0x2d3   :  { %v1881_v41 = vpop.permute.xlu0 %1880 }
 0x2d4   :  { %v1907_v20 = vrot.slane %v1881_v41, %v3350_v21 }
 0x2d7   :  { %v1893_v46 = vpop.permute.xlu0 %1892 }
 0x2d8   :  { %v1926_v29 = vrot.slane %v1893_v46, %v3350_v21 }
 0x309   :  { %v1878_v22 = vpop.permute.xlu1 %1877 }
 0x30a   :  { %v1903_v14 = vrot.slane %v1878_v22, %v3348_v51 }
 0x30c   :  { %v1908_v63 = vsel %vm408_vm2, %v1907_v20, %v1903_v14 }
 0x30d   :  { %v1890_v31 = vpop.permute.xlu1 %1889  ;;  %v1896_v0 = vpop.permute.xlu0 %1895 }
 0x30e   :  { %v1922_v62 = vrot.slane %v1890_v31, %v3348_v51  ;;  %v1931_v27 = vrot.slane %v1896_v0, %v3351_v57 }
 0x310   :  { %v1927_v1 = vsel %vm408_vm2, %v1926_v29, %v1922_v62 }
 0x311   :  { %v1884_v45 = vpop.permute.xlu1 %1883  ;;  %v1899_v40 = vpop.permute.xlu0 %1898  ;;  %v1932_v24 = vsel %vm415_vm3, %v1931_v27, %v1927_v1 }
 0x312   :  { %v1912_v44 = vrot.slane %v1884_v45, %v3351_v57  ;;  %v1936_v15 = vrot.slane %v1899_v40, %v3352_v58 }
 0x314   :  { %v1913_v3 = vsel %vm415_vm3, %v1912_v44, %v1908_v63  ;;  %v1937_v55 = vsel %vm422_vm4, %v1936_v15, %v1932_v24 }
 0x315   :  { %v1887_v38 = vpop.permute.xlu1 %1886 }
 0x316   :  { %v1917_v19 = vrot.slane %v1887_v38, %v3352_v58 }
 0x318   :  { %v1918_v30 = vsel %vm422_vm4, %v1917_v19, %v1913_v3 }
 0x319   :  { %v1938_v5 = vsel %vm443_vm5, %v1937_v55, %v1918_v30 }
 0x31a   :  { %v1940_v61 = vsel %vm446_vm6, %v1938_v5, 0.0 }
 0x31b   :  { %1941 = vadd.xlane.f32.xlu0 %v1940_v61 }
 0x347   :  { %v995_v60 = vpop.xlane.xlu1 %994 }
 0x348   :  { %v996_v42 = vadd.f32 %v995_v60, %v3354_v56 }
 0x3a8   :  { %v1942_v12 = vpop.xlane.xlu0 %1941 }
 0x3a9   :  { %v1943_v50 = vadd.f32 %v1942_v12, %v996_v42 }
 0x3ab   :  { %v1951_v26 = vadd.f32 %v1992_v54, %v1943_v50 }
 0x3ad   :  { %1953 = vst.msk [vmem:[%s3238_s9] sm:$0x3] %vm1952_vm7, %v1951_v26 }

</bundles_post_ra>
